<compile_context>
chip_gen: v7x
topology: tpu7x:2x2x1
jax: 0.10.0
libtpu: 0.0.40
codegen_flags: <defaults>
</compile_context>

<pallas_src>
import jax
import jax.numpy as jnp
from jax.experimental import pallas as pl
from jax.experimental.pallas import tpu as pltpu


def _outconv_kernel(w_ref, b_ref, x_ref, o_ref):
    """1x1 conv on one (Cin, Mt) tile -> (Cout, Mt) tile.

    w_ref: SMEM (Cout, Cin) f32 scalar weights
    b_ref: SMEM (Cout,)     f32 scalar bias
    x_ref: VMEM (Cin, Mt)   input tile  (lane-dense spatial axis)
    o_ref: VMEM (Cout, Mt)  output tile (lane-dense spatial axis)
    """
    cin, mt = x_ref.shape
    cout = o_ref.shape[0]
    x = x_ref[...].astype(jnp.float32)                    # (Cin, Mt)
    for co in range(cout):                                # Cout tiny & static
        acc = jnp.zeros((1, mt), jnp.float32) + b_ref[co]
        for ci in range(cin):                             # Cin small & static: VPU fma chain
            acc = acc + w_ref[co, ci] * x[ci:ci + 1, :]
        o_ref[co:co + 1, :] = acc.astype(o_ref.dtype)


def _pick_m_tile(m, cap):
    """Largest multiple of 128 that divides m and is <= cap (no padding needed)."""
    if m % 128 != 0:
        return m  # full-extent block is always legal; avoids any pad copy
    cap = max(cap, 128)
    best = 128
    t = 128
    while t <= min(m, cap):
        if m % t == 0:
            best = t
        t += 128
    return best


def outconv_pallas(x_nchw, weight, bias, *, m_tile_cap=16384):
    """nn.Conv2d(kernel_size=1) forward, native NCHW layout.

    x_nchw : (N, C_in, H, W)
    weight : (C_out, C_in, 1, 1)   -- PyTorch Conv2d weight layout
    bias   : (C_out,)
    returns: (N, C_out, H, W)
    """
    N, Cin, H, W = x_nchw.shape
    Cout = weight.shape[0]
    M = H * W

    # Free reshapes only — NCHW is already channel-major, no transposes.
    x3 = x_nchw.reshape(N, Cin, M)                  # (N, Cin, M)
    w_mat = weight.reshape(Cout, Cin).astype(jnp.float32)
    b_vec = bias.reshape(Cout).astype(jnp.float32)

    # Tile the spatial axis; keep double-buffered in+out tiles well under the
    # v7x VMEM budget (64 MiB physical, ~32 MiB scoped default).
    vmem_budget = 24 * 1024 * 1024
    vm_cap = max(vmem_budget // (16 * (Cin + Cout)), 128)   # f32, dbl-buffered in+out
    Mt = _pick_m_tile(M, min(m_tile_cap, vm_cap))
    grid = (N, M // Mt)

    dsize = jnp.dtype(x_nchw.dtype).itemsize
    cost = pl.CostEstimate(
        flops=2 * N * M * Cin * Cout,
        transcendentals=0,
        bytes_accessed=N * M * (Cin + Cout) * dsize + (Cout * Cin + Cout) * 4,
    )

    vmem_need = 2 * 2 * (Cin + Cout) * Mt * 4
    vmem_limit = min(max(4 * 1024 * 1024, 2 * vmem_need), 32 * 1024 * 1024)

    out = pl.pallas_call(
        _outconv_kernel,
        out_shape=jax.ShapeDtypeStruct((N, Cout, M), x_nchw.dtype),
        grid_spec=pltpu.PrefetchScalarGridSpec(
            num_scalar_prefetch=0,
            grid=grid,
            in_specs=[
                pl.BlockSpec(memory_space=pltpu.MemorySpace.SMEM),   # weights (scalars)
                pl.BlockSpec(memory_space=pltpu.MemorySpace.SMEM),   # bias (scalars)
                pl.BlockSpec((None, Cin, Mt), lambda n, m: (n, 0, m)),
            ],
            out_specs=pl.BlockSpec((None, Cout, Mt), lambda n, m: (n, 0, m)),
        ),
        compiler_params=pltpu.CompilerParams(
            dimension_semantics=("parallel", "parallel"),
            vmem_limit_bytes=vmem_limit,
        ),
        cost_estimate=cost,
    )(w_mat, b_vec, x3)

    return out.reshape(N, Cout, H, W)


if __name__ == "__main__":
    key = jax.random.PRNGKey(0)
    k_x, k_w, k_b = jax.random.split(key, 3)

    # Shapes consistent with UNet.outc = OutConv(32, n_classes=3)
    N, Cin, H, W = 2, 32, 16, 16
    Cout = 3

    x = jax.random.normal(k_x, (N, Cin, H, W), dtype=jnp.float32)
    weight = jax.random.normal(k_w, (Cout, Cin, 1, 1), dtype=jnp.float32) * 0.1
    bias = jax.random.normal(k_b, (Cout,), dtype=jnp.float32) * 0.1

    y = outconv_pallas(x, weight, bias)
    jax.block_until_ready(y)

    # Reference: plain-JAX 1x1 conv in the same NCHW layout.
    y_ref = (
        jnp.einsum("ncm,oc->nom", x.reshape(N, Cin, H * W), weight.reshape(Cout, Cin))
        .reshape(N, Cout, H, W)
        + bias[None, :, None, None]
    )
    assert y.shape == (N, Cout, H, W)
    assert jnp.allclose(y, y_ref, atol=1e-4, rtol=1e-4), "mismatch vs reference"

    print("KERNEL_OK")
</pallas_src>

<mosaic_0001>
module attributes {stable_mosaic.version = 11 : i64} {
  func.func @_outconv_kernel(%arg0: i32, %arg1: i32, %arg2: memref<3x32xf32, #tpu.memory_space<smem>>, %arg3: memref<3xf32, #tpu.memory_space<smem>>, %arg4: memref<1x32x256xf32, #tpu.memory_space<vmem>>, %arg5: memref<1x3x256xf32, #tpu.memory_space<vmem>>) attributes {dimension_semantics = [#tpu.dimension_semantics<parallel>, #tpu.dimension_semantics<parallel>], iteration_bounds = array<i64: 2, 1>, scalar_prefetch = 0 : i64, scratch_operands = 0 : i64, tpu.core_type = #tpu.core_type<tc>, window_params = [{transform_indices = @transform_0, window_bounds = array<i64: 3, 32>}, {transform_indices = @transform_1, window_bounds = array<i64: 3>}, {transform_indices = @transform_2, window_bounds = array<i64: 1, 32, 256>}, {transform_indices = @transform_3, window_bounds = array<i64: 1, 3, 256>}]} {
    %c0 = arith.constant 0 : index
    %c0_0 = arith.constant 0 : index
    %c0_1 = arith.constant 0 : index
    %0 = vector.load %arg4[%c0, %c0_0, %c0_1] : memref<1x32x256xf32, #tpu.memory_space<vmem>>, vector<1x32x256xf32>
    %1 = vector.shape_cast %0 : vector<1x32x256xf32> to vector<32x256xf32>
    %cst = arith.constant 0.000000e+00 : f32
    %2 = vector.broadcast %cst : f32 to vector<1x256xf32>
    %c0_2 = arith.constant 0 : index
    %3 = memref.load %arg3[%c0_2] : memref<3xf32, #tpu.memory_space<smem>>
    %4 = vector.broadcast %3 : f32 to vector<1x256xf32>
    %5 = arith.addf %2, %4 : vector<1x256xf32>
    %c0_3 = arith.constant 0 : index
    %c0_4 = arith.constant 0 : index
    %6 = memref.load %arg2[%c0_3, %c0_4] : memref<3x32xf32, #tpu.memory_space<smem>>
    %7 = vector.extract_strided_slice %1 {offsets = [0, 0], sizes = [1, 256], strides = [1, 1]} : vector<32x256xf32> to vector<1x256xf32>
    %8 = vector.broadcast %6 : f32 to vector<1x256xf32>
    %9 = arith.mulf %8, %7 : vector<1x256xf32>
    %10 = arith.addf %5, %9 : vector<1x256xf32>
    %c0_5 = arith.constant 0 : index
    %c1 = arith.constant 1 : index
    %11 = memref.load %arg2[%c0_5, %c1] : memref<3x32xf32, #tpu.memory_space<smem>>
    %12 = vector.extract_strided_slice %1 {offsets = [1, 0], sizes = [1, 256], strides = [1, 1]} : vector<32x256xf32> to vector<1x256xf32>
    %13 = vector.broadcast %11 : f32 to vector<1x256xf32>
    %14 = arith.mulf %13, %12 : vector<1x256xf32>
    %15 = arith.addf %10, %14 : vector<1x256xf32>
    %c0_6 = arith.constant 0 : index
    %c2 = arith.constant 2 : index
    %16 = memref.load %arg2[%c0_6, %c2] : memref<3x32xf32, #tpu.memory_space<smem>>
    %17 = vector.extract_strided_slice %1 {offsets = [2, 0], sizes = [1, 256], strides = [1, 1]} : vector<32x256xf32> to vector<1x256xf32>
    %18 = vector.broadcast %16 : f32 to vector<1x256xf32>
    %19 = arith.mulf %18, %17 : vector<1x256xf32>
    %20 = arith.addf %15, %19 : vector<1x256xf32>
    %c0_7 = arith.constant 0 : index
    %c3 = arith.constant 3 : index
    %21 = memref.load %arg2[%c0_7, %c3] : memref<3x32xf32, #tpu.memory_space<smem>>
    %22 = vector.extract_strided_slice %1 {offsets = [3, 0], sizes = [1, 256], strides = [1, 1]} : vector<32x256xf32> to vector<1x256xf32>
    %23 = vector.broadcast %21 : f32 to vector<1x256xf32>
    %24 = arith.mulf %23, %22 : vector<1x256xf32>
    %25 = arith.addf %20, %24 : vector<1x256xf32>
    %c0_8 = arith.constant 0 : index
    %c4 = arith.constant 4 : index
    %26 = memref.load %arg2[%c0_8, %c4] : memref<3x32xf32, #tpu.memory_space<smem>>
    %27 = vector.extract_strided_slice %1 {offsets = [4, 0], sizes = [1, 256], strides = [1, 1]} : vector<32x256xf32> to vector<1x256xf32>
    %28 = vector.broadcast %26 : f32 to vector<1x256xf32>
    %29 = arith.mulf %28, %27 : vector<1x256xf32>
    %30 = arith.addf %25, %29 : vector<1x256xf32>
    %c0_9 = arith.constant 0 : index
    %c5 = arith.constant 5 : index
    %31 = memref.load %arg2[%c0_9, %c5] : memref<3x32xf32, #tpu.memory_space<smem>>
    %32 = vector.extract_strided_slice %1 {offsets = [5, 0], sizes = [1, 256], strides = [1, 1]} : vector<32x256xf32> to vector<1x256xf32>
    %33 = vector.broadcast %31 : f32 to vector<1x256xf32>
    %34 = arith.mulf %33, %32 : vector<1x256xf32>
    %35 = arith.addf %30, %34 : vector<1x256xf32>
    %c0_10 = arith.constant 0 : index
    %c6 = arith.constant 6 : index
    %36 = memref.load %arg2[%c0_10, %c6] : memref<3x32xf32, #tpu.memory_space<smem>>
    %37 = vector.extract_strided_slice %1 {offsets = [6, 0], sizes = [1, 256], strides = [1, 1]} : vector<32x256xf32> to vector<1x256xf32>
    %38 = vector.broadcast %36 : f32 to vector<1x256xf32>
    %39 = arith.mulf %38, %37 : vector<1x256xf32>
    %40 = arith.addf %35, %39 : vector<1x256xf32>
    %c0_11 = arith.constant 0 : index
    %c7 = arith.constant 7 : index
    %41 = memref.load %arg2[%c0_11, %c7] : memref<3x32xf32, #tpu.memory_space<smem>>
    %42 = vector.extract_strided_slice %1 {offsets = [7, 0], sizes = [1, 256], strides = [1, 1]} : vector<32x256xf32> to vector<1x256xf32>
    %43 = vector.broadcast %41 : f32 to vector<1x256xf32>
    %44 = arith.mulf %43, %42 : vector<1x256xf32>
    %45 = arith.addf %40, %44 : vector<1x256xf32>
    %c0_12 = arith.constant 0 : index
    %c8 = arith.constant 8 : index
    %46 = memref.load %arg2[%c0_12, %c8] : memref<3x32xf32, #tpu.memory_space<smem>>
    %47 = vector.extract_strided_slice %1 {offsets = [8, 0], sizes = [1, 256], strides = [1, 1]} : vector<32x256xf32> to vector<1x256xf32>
    %48 = vector.broadcast %46 : f32 to vector<1x256xf32>
    %49 = arith.mulf %48, %47 : vector<1x256xf32>
    %50 = arith.addf %45, %49 : vector<1x256xf32>
    %c0_13 = arith.constant 0 : index
    %c9 = arith.constant 9 : index
    %51 = memref.load %arg2[%c0_13, %c9] : memref<3x32xf32, #tpu.memory_space<smem>>
    %52 = vector.extract_strided_slice %1 {offsets = [9, 0], sizes = [1, 256], strides = [1, 1]} : vector<32x256xf32> to vector<1x256xf32>
    %53 = vector.broadcast %51 : f32 to vector<1x256xf32>
    %54 = arith.mulf %53, %52 : vector<1x256xf32>
    %55 = arith.addf %50, %54 : vector<1x256xf32>
    %c0_14 = arith.constant 0 : index
    %c10 = arith.constant 10 : index
    %56 = memref.load %arg2[%c0_14, %c10] : memref<3x32xf32, #tpu.memory_space<smem>>
    %57 = vector.extract_strided_slice %1 {offsets = [10, 0], sizes = [1, 256], strides = [1, 1]} : vector<32x256xf32> to vector<1x256xf32>
    %58 = vector.broadcast %56 : f32 to vector<1x256xf32>
    %59 = arith.mulf %58, %57 : vector<1x256xf32>
    %60 = arith.addf %55, %59 : vector<1x256xf32>
    %c0_15 = arith.constant 0 : index
    %c11 = arith.constant 11 : index
    %61 = memref.load %arg2[%c0_15, %c11] : memref<3x32xf32, #tpu.memory_space<smem>>
    %62 = vector.extract_strided_slice %1 {offsets = [11, 0], sizes = [1, 256], strides = [1, 1]} : vector<32x256xf32> to vector<1x256xf32>
    %63 = vector.broadcast %61 : f32 to vector<1x256xf32>
    %64 = arith.mulf %63, %62 : vector<1x256xf32>
    %65 = arith.addf %60, %64 : vector<1x256xf32>
    %c0_16 = arith.constant 0 : index
    %c12 = arith.constant 12 : index
    %66 = memref.load %arg2[%c0_16, %c12] : memref<3x32xf32, #tpu.memory_space<smem>>
    %67 = vector.extract_strided_slice %1 {offsets = [12, 0], sizes = [1, 256], strides = [1, 1]} : vector<32x256xf32> to vector<1x256xf32>
    %68 = vector.broadcast %66 : f32 to vector<1x256xf32>
    %69 = arith.mulf %68, %67 : vector<1x256xf32>
    %70 = arith.addf %65, %69 : vector<1x256xf32>
    %c0_17 = arith.constant 0 : index
    %c13 = arith.constant 13 : index
    %71 = memref.load %arg2[%c0_17, %c13] : memref<3x32xf32, #tpu.memory_space<smem>>
    %72 = vector.extract_strided_slice %1 {offsets = [13, 0], sizes = [1, 256], strides = [1, 1]} : vector<32x256xf32> to vector<1x256xf32>
    %73 = vector.broadcast %71 : f32 to vector<1x256xf32>
    %74 = arith.mulf %73, %72 : vector<1x256xf32>
    %75 = arith.addf %70, %74 : vector<1x256xf32>
    %c0_18 = arith.constant 0 : index
    %c14 = arith.constant 14 : index
    %76 = memref.load %arg2[%c0_18, %c14] : memref<3x32xf32, #tpu.memory_space<smem>>
    %77 = vector.extract_strided_slice %1 {offsets = [14, 0], sizes = [1, 256], strides = [1, 1]} : vector<32x256xf32> to vector<1x256xf32>
    %78 = vector.broadcast %76 : f32 to vector<1x256xf32>
    %79 = arith.mulf %78, %77 : vector<1x256xf32>
    %80 = arith.addf %75, %79 : vector<1x256xf32>
    %c0_19 = arith.constant 0 : index
    %c15 = arith.constant 15 : index
    %81 = memref.load %arg2[%c0_19, %c15] : memref<3x32xf32, #tpu.memory_space<smem>>
    %82 = vector.extract_strided_slice %1 {offsets = [15, 0], sizes = [1, 256], strides = [1, 1]} : vector<32x256xf32> to vector<1x256xf32>
    %83 = vector.broadcast %81 : f32 to vector<1x256xf32>
    %84 = arith.mulf %83, %82 : vector<1x256xf32>
    %85 = arith.addf %80, %84 : vector<1x256xf32>
    %c0_20 = arith.constant 0 : index
    %c16 = arith.constant 16 : index
    %86 = memref.load %arg2[%c0_20, %c16] : memref<3x32xf32, #tpu.memory_space<smem>>
    %87 = vector.extract_strided_slice %1 {offsets = [16, 0], sizes = [1, 256], strides = [1, 1]} : vector<32x256xf32> to vector<1x256xf32>
    %88 = vector.broadcast %86 : f32 to vector<1x256xf32>
    %89 = arith.mulf %88, %87 : vector<1x256xf32>
    %90 = arith.addf %85, %89 : vector<1x256xf32>
    %c0_21 = arith.constant 0 : index
    %c17 = arith.constant 17 : index
    %91 = memref.load %arg2[%c0_21, %c17] : memref<3x32xf32, #tpu.memory_space<smem>>
    %92 = vector.extract_strided_slice %1 {offsets = [17, 0], sizes = [1, 256], strides = [1, 1]} : vector<32x256xf32> to vector<1x256xf32>
    %93 = vector.broadcast %91 : f32 to vector<1x256xf32>
    %94 = arith.mulf %93, %92 : vector<1x256xf32>
    %95 = arith.addf %90, %94 : vector<1x256xf32>
    %c0_22 = arith.constant 0 : index
    %c18 = arith.constant 18 : index
    %96 = memref.load %arg2[%c0_22, %c18] : memref<3x32xf32, #tpu.memory_space<smem>>
    %97 = vector.extract_strided_slice %1 {offsets = [18, 0], sizes = [1, 256], strides = [1, 1]} : vector<32x256xf32> to vector<1x256xf32>
    %98 = vector.broadcast %96 : f32 to vector<1x256xf32>
    %99 = arith.mulf %98, %97 : vector<1x256xf32>
    %100 = arith.addf %95, %99 : vector<1x256xf32>
    %c0_23 = arith.constant 0 : index
    %c19 = arith.constant 19 : index
    %101 = memref.load %arg2[%c0_23, %c19] : memref<3x32xf32, #tpu.memory_space<smem>>
    %102 = vector.extract_strided_slice %1 {offsets = [19, 0], sizes = [1, 256], strides = [1, 1]} : vector<32x256xf32> to vector<1x256xf32>
    %103 = vector.broadcast %101 : f32 to vector<1x256xf32>
    %104 = arith.mulf %103, %102 : vector<1x256xf32>
    %105 = arith.addf %100, %104 : vector<1x256xf32>
    %c0_24 = arith.constant 0 : index
    %c20 = arith.constant 20 : index
    %106 = memref.load %arg2[%c0_24, %c20] : memref<3x32xf32, #tpu.memory_space<smem>>
    %107 = vector.extract_strided_slice %1 {offsets = [20, 0], sizes = [1, 256], strides = [1, 1]} : vector<32x256xf32> to vector<1x256xf32>
    %108 = vector.broadcast %106 : f32 to vector<1x256xf32>
    %109 = arith.mulf %108, %107 : vector<1x256xf32>
    %110 = arith.addf %105, %109 : vector<1x256xf32>
    %c0_25 = arith.constant 0 : index
    %c21 = arith.constant 21 : index
    %111 = memref.load %arg2[%c0_25, %c21] : memref<3x32xf32, #tpu.memory_space<smem>>
    %112 = vector.extract_strided_slice %1 {offsets = [21, 0], sizes = [1, 256], strides = [1, 1]} : vector<32x256xf32> to vector<1x256xf32>
    %113 = vector.broadcast %111 : f32 to vector<1x256xf32>
    %114 = arith.mulf %113, %112 : vector<1x256xf32>
    %115 = arith.addf %110, %114 : vector<1x256xf32>
    %c0_26 = arith.constant 0 : index
    %c22 = arith.constant 22 : index
    %116 = memref.load %arg2[%c0_26, %c22] : memref<3x32xf32, #tpu.memory_space<smem>>
    %117 = vector.extract_strided_slice %1 {offsets = [22, 0], sizes = [1, 256], strides = [1, 1]} : vector<32x256xf32> to vector<1x256xf32>
    %118 = vector.broadcast %116 : f32 to vector<1x256xf32>
    %119 = arith.mulf %118, %117 : vector<1x256xf32>
    %120 = arith.addf %115, %119 : vector<1x256xf32>
    %c0_27 = arith.constant 0 : index
    %c23 = arith.constant 23 : index
    %121 = memref.load %arg2[%c0_27, %c23] : memref<3x32xf32, #tpu.memory_space<smem>>
    %122 = vector.extract_strided_slice %1 {offsets = [23, 0], sizes = [1, 256], strides = [1, 1]} : vector<32x256xf32> to vector<1x256xf32>
    %123 = vector.broadcast %121 : f32 to vector<1x256xf32>
    %124 = arith.mulf %123, %122 : vector<1x256xf32>
    %125 = arith.addf %120, %124 : vector<1x256xf32>
    %c0_28 = arith.constant 0 : index
    %c24 = arith.constant 24 : index
    %126 = memref.load %arg2[%c0_28, %c24] : memref<3x32xf32, #tpu.memory_space<smem>>
    %127 = vector.extract_strided_slice %1 {offsets = [24, 0], sizes = [1, 256], strides = [1, 1]} : vector<32x256xf32> to vector<1x256xf32>
    %128 = vector.broadcast %126 : f32 to vector<1x256xf32>
    %129 = arith.mulf %128, %127 : vector<1x256xf32>
    %130 = arith.addf %125, %129 : vector<1x256xf32>
    %c0_29 = arith.constant 0 : index
    %c25 = arith.constant 25 : index
    %131 = memref.load %arg2[%c0_29, %c25] : memref<3x32xf32, #tpu.memory_space<smem>>
    %132 = vector.extract_strided_slice %1 {offsets = [25, 0], sizes = [1, 256], strides = [1, 1]} : vector<32x256xf32> to vector<1x256xf32>
    %133 = vector.broadcast %131 : f32 to vector<1x256xf32>
    %134 = arith.mulf %133, %132 : vector<1x256xf32>
    %135 = arith.addf %130, %134 : vector<1x256xf32>
    %c0_30 = arith.constant 0 : index
    %c26 = arith.constant 26 : index
    %136 = memref.load %arg2[%c0_30, %c26] : memref<3x32xf32, #tpu.memory_space<smem>>
    %137 = vector.extract_strided_slice %1 {offsets = [26, 0], sizes = [1, 256], strides = [1, 1]} : vector<32x256xf32> to vector<1x256xf32>
    %138 = vector.broadcast %136 : f32 to vector<1x256xf32>
    %139 = arith.mulf %138, %137 : vector<1x256xf32>
    %140 = arith.addf %135, %139 : vector<1x256xf32>
    %c0_31 = arith.constant 0 : index
    %c27 = arith.constant 27 : index
    %141 = memref.load %arg2[%c0_31, %c27] : memref<3x32xf32, #tpu.memory_space<smem>>
    %142 = vector.extract_strided_slice %1 {offsets = [27, 0], sizes = [1, 256], strides = [1, 1]} : vector<32x256xf32> to vector<1x256xf32>
    %143 = vector.broadcast %141 : f32 to vector<1x256xf32>
    %144 = arith.mulf %143, %142 : vector<1x256xf32>
    %145 = arith.addf %140, %144 : vector<1x256xf32>
    %c0_32 = arith.constant 0 : index
    %c28 = arith.constant 28 : index
    %146 = memref.load %arg2[%c0_32, %c28] : memref<3x32xf32, #tpu.memory_space<smem>>
    %147 = vector.extract_strided_slice %1 {offsets = [28, 0], sizes = [1, 256], strides = [1, 1]} : vector<32x256xf32> to vector<1x256xf32>
    %148 = vector.broadcast %146 : f32 to vector<1x256xf32>
    %149 = arith.mulf %148, %147 : vector<1x256xf32>
    %150 = arith.addf %145, %149 : vector<1x256xf32>
    %c0_33 = arith.constant 0 : index
    %c29 = arith.constant 29 : index
    %151 = memref.load %arg2[%c0_33, %c29] : memref<3x32xf32, #tpu.memory_space<smem>>
    %152 = vector.extract_strided_slice %1 {offsets = [29, 0], sizes = [1, 256], strides = [1, 1]} : vector<32x256xf32> to vector<1x256xf32>
    %153 = vector.broadcast %151 : f32 to vector<1x256xf32>
    %154 = arith.mulf %153, %152 : vector<1x256xf32>
    %155 = arith.addf %150, %154 : vector<1x256xf32>
    %c0_34 = arith.constant 0 : index
    %c30 = arith.constant 30 : index
    %156 = memref.load %arg2[%c0_34, %c30] : memref<3x32xf32, #tpu.memory_space<smem>>
    %157 = vector.extract_strided_slice %1 {offsets = [30, 0], sizes = [1, 256], strides = [1, 1]} : vector<32x256xf32> to vector<1x256xf32>
    %158 = vector.broadcast %156 : f32 to vector<1x256xf32>
    %159 = arith.mulf %158, %157 : vector<1x256xf32>
    %160 = arith.addf %155, %159 : vector<1x256xf32>
    %c0_35 = arith.constant 0 : index
    %c31 = arith.constant 31 : index
    %161 = memref.load %arg2[%c0_35, %c31] : memref<3x32xf32, #tpu.memory_space<smem>>
    %162 = vector.extract_strided_slice %1 {offsets = [31, 0], sizes = [1, 256], strides = [1, 1]} : vector<32x256xf32> to vector<1x256xf32>
    %163 = vector.broadcast %161 : f32 to vector<1x256xf32>
    %164 = arith.mulf %163, %162 : vector<1x256xf32>
    %165 = arith.addf %160, %164 : vector<1x256xf32>
    %c0_36 = arith.constant 0 : index
    %c0_37 = arith.constant 0 : index
    %c0_38 = arith.constant 0 : index
    %166 = vector.load %arg5[%c0_36, %c0_37, %c0_38] : memref<1x3x256xf32, #tpu.memory_space<vmem>>, vector<1x1x256xf32>
    %167 = vector.shape_cast %166 : vector<1x1x256xf32> to vector<1x256xf32>
    %168 = vector.shape_cast %165 : vector<1x256xf32> to vector<1x1x256xf32>
    tpu.vector_store %arg5[%c0_36, %c0_37, %c0_38], %168 {strides = array<i32>} : memref<1x3x256xf32, #tpu.memory_space<vmem>>, vector<1x1x256xf32>,
    %cst_39 = arith.constant 0.000000e+00 : f32
    %169 = vector.broadcast %cst_39 : f32 to vector<1x256xf32>
    %c1_40 = arith.constant 1 : index
    %170 = memref.load %arg3[%c1_40] : memref<3xf32, #tpu.memory_space<smem>>
    %171 = vector.broadcast %170 : f32 to vector<1x256xf32>
    %172 = arith.addf %169, %171 : vector<1x256xf32>
    %c1_41 = arith.constant 1 : index
    %c0_42 = arith.constant 0 : index
    %173 = memref.load %arg2[%c1_41, %c0_42] : memref<3x32xf32, #tpu.memory_space<smem>>
    %174 = vector.extract_strided_slice %1 {offsets = [0, 0], sizes = [1, 256], strides = [1, 1]} : vector<32x256xf32> to vector<1x256xf32>
    %175 = vector.broadcast %173 : f32 to vector<1x256xf32>
    %176 = arith.mulf %175, %174 : vector<1x256xf32>
    %177 = arith.addf %172, %176 : vector<1x256xf32>
    %c1_43 = arith.constant 1 : index
    %c1_44 = arith.constant 1 : index
    %178 = memref.load %arg2[%c1_43, %c1_44] : memref<3x32xf32, #tpu.memory_space<smem>>
    %179 = vector.extract_strided_slice %1 {offsets = [1, 0], sizes = [1, 256], strides = [1, 1]} : vector<32x256xf32> to vector<1x256xf32>
    %180 = vector.broadcast %178 : f32 to vector<1x256xf32>
    %181 = arith.mulf %180, %179 : vector<1x256xf32>
    %182 = arith.addf %177, %181 : vector<1x256xf32>
    %c1_45 = arith.constant 1 : index
    %c2_46 = arith.constant 2 : index
    %183 = memref.load %arg2[%c1_45, %c2_46] : memref<3x32xf32, #tpu.memory_space<smem>>
    %184 = vector.extract_strided_slice %1 {offsets = [2, 0], sizes = [1, 256], strides = [1, 1]} : vector<32x256xf32> to vector<1x256xf32>
    %185 = vector.broadcast %183 : f32 to vector<1x256xf32>
    %186 = arith.mulf %185, %184 : vector<1x256xf32>
    %187 = arith.addf %182, %186 : vector<1x256xf32>
    %c1_47 = arith.constant 1 : index
    %c3_48 = arith.constant 3 : index
    %188 = memref.load %arg2[%c1_47, %c3_48] : memref<3x32xf32, #tpu.memory_space<smem>>
    %189 = vector.extract_strided_slice %1 {offsets = [3, 0], sizes = [1, 256], strides = [1, 1]} : vector<32x256xf32> to vector<1x256xf32>
    %190 = vector.broadcast %188 : f32 to vector<1x256xf32>
    %191 = arith.mulf %190, %189 : vector<1x256xf32>
    %192 = arith.addf %187, %191 : vector<1x256xf32>
    %c1_49 = arith.constant 1 : index
    %c4_50 = arith.constant 4 : index
    %193 = memref.load %arg2[%c1_49, %c4_50] : memref<3x32xf32, #tpu.memory_space<smem>>
    %194 = vector.extract_strided_slice %1 {offsets = [4, 0], sizes = [1, 256], strides = [1, 1]} : vector<32x256xf32> to vector<1x256xf32>
    %195 = vector.broadcast %193 : f32 to vector<1x256xf32>
    %196 = arith.mulf %195, %194 : vector<1x256xf32>
    %197 = arith.addf %192, %196 : vector<1x256xf32>
    %c1_51 = arith.constant 1 : index
    %c5_52 = arith.constant 5 : index
    %198 = memref.load %arg2[%c1_51, %c5_52] : memref<3x32xf32, #tpu.memory_space<smem>>
    %199 = vector.extract_strided_slice %1 {offsets = [5, 0], sizes = [1, 256], strides = [1, 1]} : vector<32x256xf32> to vector<1x256xf32>
    %200 = vector.broadcast %198 : f32 to vector<1x256xf32>
    %201 = arith.mulf %200, %199 : vector<1x256xf32>
    %202 = arith.addf %197, %201 : vector<1x256xf32>
    %c1_53 = arith.constant 1 : index
    %c6_54 = arith.constant 6 : index
    %203 = memref.load %arg2[%c1_53, %c6_54] : memref<3x32xf32, #tpu.memory_space<smem>>
    %204 = vector.extract_strided_slice %1 {offsets = [6, 0], sizes = [1, 256], strides = [1, 1]} : vector<32x256xf32> to vector<1x256xf32>
    %205 = vector.broadcast %203 : f32 to vector<1x256xf32>
    %206 = arith.mulf %205, %204 : vector<1x256xf32>
    %207 = arith.addf %202, %206 : vector<1x256xf32>
    %c1_55 = arith.constant 1 : index
    %c7_56 = arith.constant 7 : index
    %208 = memref.load %arg2[%c1_55, %c7_56] : memref<3x32xf32, #tpu.memory_space<smem>>
    %209 = vector.extract_strided_slice %1 {offsets = [7, 0], sizes = [1, 256], strides = [1, 1]} : vector<32x256xf32> to vector<1x256xf32>
    %210 = vector.broadcast %208 : f32 to vector<1x256xf32>
    %211 = arith.mulf %210, %209 : vector<1x256xf32>
    %212 = arith.addf %207, %211 : vector<1x256xf32>
    %c1_57 = arith.constant 1 : index
    %c8_58 = arith.constant 8 : index
    %213 = memref.load %arg2[%c1_57, %c8_58] : memref<3x32xf32, #tpu.memory_space<smem>>
    %214 = vector.extract_strided_slice %1 {offsets = [8, 0], sizes = [1, 256], strides = [1, 1]} : vector<32x256xf32> to vector<1x256xf32>
    %215 = vector.broadcast %213 : f32 to vector<1x256xf32>
    %216 = arith.mulf %215, %214 : vector<1x256xf32>
    %217 = arith.addf %212, %216 : vector<1x256xf32>
    %c1_59 = arith.constant 1 : index
    %c9_60 = arith.constant 9 : index
    %218 = memref.load %arg2[%c1_59, %c9_60] : memref<3x32xf32, #tpu.memory_space<smem>>
    %219 = vector.extract_strided_slice %1 {offsets = [9, 0], sizes = [1, 256], strides = [1, 1]} : vector<32x256xf32> to vector<1x256xf32>
    %220 = vector.broadcast %218 : f32 to vector<1x256xf32>
    %221 = arith.mulf %220, %219 : vector<1x256xf32>
    %222 = arith.addf %217, %221 : vector<1x256xf32>
    %c1_61 = arith.constant 1 : index
    %c10_62 = arith.constant 10 : index
    %223 = memref.load %arg2[%c1_61, %c10_62] : memref<3x32xf32, #tpu.memory_space<smem>>
    %224 = vector.extract_strided_slice %1 {offsets = [10, 0], sizes = [1, 256], strides = [1, 1]} : vector<32x256xf32> to vector<1x256xf32>
    %225 = vector.broadcast %223 : f32 to vector<1x256xf32>
    %226 = arith.mulf %225, %224 : vector<1x256xf32>
    %227 = arith.addf %222, %226 : vector<1x256xf32>
    %c1_63 = arith.constant 1 : index
    %c11_64 = arith.constant 11 : index
    %228 = memref.load %arg2[%c1_63, %c11_64] : memref<3x32xf32, #tpu.memory_space<smem>>
    %229 = vector.extract_strided_slice %1 {offsets = [11, 0], sizes = [1, 256], strides = [1, 1]} : vector<32x256xf32> to vector<1x256xf32>
    %230 = vector.broadcast %228 : f32 to vector<1x256xf32>
    %231 = arith.mulf %230, %229 : vector<1x256xf32>
    %232 = arith.addf %227, %231 : vector<1x256xf32>
    %c1_65 = arith.constant 1 : index
    %c12_66 = arith.constant 12 : index
    %233 = memref.load %arg2[%c1_65, %c12_66] : memref<3x32xf32, #tpu.memory_space<smem>>
    %234 = vector.extract_strided_slice %1 {offsets = [12, 0], sizes = [1, 256], strides = [1, 1]} : vector<32x256xf32> to vector<1x256xf32>
    %235 = vector.broadcast %233 : f32 to vector<1x256xf32>
    %236 = arith.mulf %235, %234 : vector<1x256xf32>
    %237 = arith.addf %232, %236 : vector<1x256xf32>
    %c1_67 = arith.constant 1 : index
    %c13_68 = arith.constant 13 : index
    %238 = memref.load %arg2[%c1_67, %c13_68] : memref<3x32xf32, #tpu.memory_space<smem>>
    %239 = vector.extract_strided_slice %1 {offsets = [13, 0], sizes = [1, 256], strides = [1, 1]} : vector<32x256xf32> to vector<1x256xf32>
    %240 = vector.broadcast %238 : f32 to vector<1x256xf32>
    %241 = arith.mulf %240, %239 : vector<1x256xf32>
    %242 = arith.addf %237, %241 : vector<1x256xf32>
    %c1_69 = arith.constant 1 : index
    %c14_70 = arith.constant 14 : index
    %243 = memref.load %arg2[%c1_69, %c14_70] : memref<3x32xf32, #tpu.memory_space<smem>>
    %244 = vector.extract_strided_slice %1 {offsets = [14, 0], sizes = [1, 256], strides = [1, 1]} : vector<32x256xf32> to vector<1x256xf32>
    %245 = vector.broadcast %243 : f32 to vector<1x256xf32>
    %246 = arith.mulf %245, %244 : vector<1x256xf32>
    %247 = arith.addf %242, %246 : vector<1x256xf32>
    %c1_71 = arith.constant 1 : index
    %c15_72 = arith.constant 15 : index
    %248 = memref.load %arg2[%c1_71, %c15_72] : memref<3x32xf32, #tpu.memory_space<smem>>
    %249 = vector.extract_strided_slice %1 {offsets = [15, 0], sizes = [1, 256], strides = [1, 1]} : vector<32x256xf32> to vector<1x256xf32>
    %250 = vector.broadcast %248 : f32 to vector<1x256xf32>
    %251 = arith.mulf %250, %249 : vector<1x256xf32>
    %252 = arith.addf %247, %251 : vector<1x256xf32>
    %c1_73 = arith.constant 1 : index
    %c16_74 = arith.constant 16 : index
    %253 = memref.load %arg2[%c1_73, %c16_74] : memref<3x32xf32, #tpu.memory_space<smem>>
    %254 = vector.extract_strided_slice %1 {offsets = [16, 0], sizes = [1, 256], strides = [1, 1]} : vector<32x256xf32> to vector<1x256xf32>
    %255 = vector.broadcast %253 : f32 to vector<1x256xf32>
    %256 = arith.mulf %255, %254 : vector<1x256xf32>
    %257 = arith.addf %252, %256 : vector<1x256xf32>
    %c1_75 = arith.constant 1 : index
    %c17_76 = arith.constant 17 : index
    %258 = memref.load %arg2[%c1_75, %c17_76] : memref<3x32xf32, #tpu.memory_space<smem>>
    %259 = vector.extract_strided_slice %1 {offsets = [17, 0], sizes = [1, 256], strides = [1, 1]} : vector<32x256xf32> to vector<1x256xf32>
    %260 = vector.broadcast %258 : f32 to vector<1x256xf32>
    %261 = arith.mulf %260, %259 : vector<1x256xf32>
    %262 = arith.addf %257, %261 : vector<1x256xf32>
    %c1_77 = arith.constant 1 : index
    %c18_78 = arith.constant 18 : index
    %263 = memref.load %arg2[%c1_77, %c18_78] : memref<3x32xf32, #tpu.memory_space<smem>>
    %264 = vector.extract_strided_slice %1 {offsets = [18, 0], sizes = [1, 256], strides = [1, 1]} : vector<32x256xf32> to vector<1x256xf32>
    %265 = vector.broadcast %263 : f32 to vector<1x256xf32>
    %266 = arith.mulf %265, %264 : vector<1x256xf32>
    %267 = arith.addf %262, %266 : vector<1x256xf32>
    %c1_79 = arith.constant 1 : index
    %c19_80 = arith.constant 19 : index
    %268 = memref.load %arg2[%c1_79, %c19_80] : memref<3x32xf32, #tpu.memory_space<smem>>
    %269 = vector.extract_strided_slice %1 {offsets = [19, 0], sizes = [1, 256], strides = [1, 1]} : vector<32x256xf32> to vector<1x256xf32>
    %270 = vector.broadcast %268 : f32 to vector<1x256xf32>
    %271 = arith.mulf %270, %269 : vector<1x256xf32>
    %272 = arith.addf %267, %271 : vector<1x256xf32>
    %c1_81 = arith.constant 1 : index
    %c20_82 = arith.constant 20 : index
    %273 = memref.load %arg2[%c1_81, %c20_82] : memref<3x32xf32, #tpu.memory_space<smem>>
    %274 = vector.extract_strided_slice %1 {offsets = [20, 0], sizes = [1, 256], strides = [1, 1]} : vector<32x256xf32> to vector<1x256xf32>
    %275 = vector.broadcast %273 : f32 to vector<1x256xf32>
    %276 = arith.mulf %275, %274 : vector<1x256xf32>
    %277 = arith.addf %272, %276 : vector<1x256xf32>
    %c1_83 = arith.constant 1 : index
    %c21_84 = arith.constant 21 : index
    %278 = memref.load %arg2[%c1_83, %c21_84] : memref<3x32xf32, #tpu.memory_space<smem>>
    %279 = vector.extract_strided_slice %1 {offsets = [21, 0], sizes = [1, 256], strides = [1, 1]} : vector<32x256xf32> to vector<1x256xf32>
    %280 = vector.broadcast %278 : f32 to vector<1x256xf32>
    %281 = arith.mulf %280, %279 : vector<1x256xf32>
    %282 = arith.addf %277, %281 : vector<1x256xf32>
    %c1_85 = arith.constant 1 : index
    %c22_86 = arith.constant 22 : index
    %283 = memref.load %arg2[%c1_85, %c22_86] : memref<3x32xf32, #tpu.memory_space<smem>>
    %284 = vector.extract_strided_slice %1 {offsets = [22, 0], sizes = [1, 256], strides = [1, 1]} : vector<32x256xf32> to vector<1x256xf32>
    %285 = vector.broadcast %283 : f32 to vector<1x256xf32>
    %286 = arith.mulf %285, %284 : vector<1x256xf32>
    %287 = arith.addf %282, %286 : vector<1x256xf32>
    %c1_87 = arith.constant 1 : index
    %c23_88 = arith.constant 23 : index
    %288 = memref.load %arg2[%c1_87, %c23_88] : memref<3x32xf32, #tpu.memory_space<smem>>
    %289 = vector.extract_strided_slice %1 {offsets = [23, 0], sizes = [1, 256], strides = [1, 1]} : vector<32x256xf32> to vector<1x256xf32>
    %290 = vector.broadcast %288 : f32 to vector<1x256xf32>
    %291 = arith.mulf %290, %289 : vector<1x256xf32>
    %292 = arith.addf %287, %291 : vector<1x256xf32>
    %c1_89 = arith.constant 1 : index
    %c24_90 = arith.constant 24 : index
    %293 = memref.load %arg2[%c1_89, %c24_90] : memref<3x32xf32, #tpu.memory_space<smem>>
    %294 = vector.extract_strided_slice %1 {offsets = [24, 0], sizes = [1, 256], strides = [1, 1]} : vector<32x256xf32> to vector<1x256xf32>
    %295 = vector.broadcast %293 : f32 to vector<1x256xf32>
    %296 = arith.mulf %295, %294 : vector<1x256xf32>
    %297 = arith.addf %292, %296 : vector<1x256xf32>
    %c1_91 = arith.constant 1 : index
    %c25_92 = arith.constant 25 : index
    %298 = memref.load %arg2[%c1_91, %c25_92] : memref<3x32xf32, #tpu.memory_space<smem>>
    %299 = vector.extract_strided_slice %1 {offsets = [25, 0], sizes = [1, 256], strides = [1, 1]} : vector<32x256xf32> to vector<1x256xf32>
    %300 = vector.broadcast %298 : f32 to vector<1x256xf32>
    %301 = arith.mulf %300, %299 : vector<1x256xf32>
    %302 = arith.addf %297, %301 : vector<1x256xf32>
    %c1_93 = arith.constant 1 : index
    %c26_94 = arith.constant 26 : index
    %303 = memref.load %arg2[%c1_93, %c26_94] : memref<3x32xf32, #tpu.memory_space<smem>>
    %304 = vector.extract_strided_slice %1 {offsets = [26, 0], sizes = [1, 256], strides = [1, 1]} : vector<32x256xf32> to vector<1x256xf32>
    %305 = vector.broadcast %303 : f32 to vector<1x256xf32>
    %306 = arith.mulf %305, %304 : vector<1x256xf32>
    %307 = arith.addf %302, %306 : vector<1x256xf32>
    %c1_95 = arith.constant 1 : index
    %c27_96 = arith.constant 27 : index
    %308 = memref.load %arg2[%c1_95, %c27_96] : memref<3x32xf32, #tpu.memory_space<smem>>
    %309 = vector.extract_strided_slice %1 {offsets = [27, 0], sizes = [1, 256], strides = [1, 1]} : vector<32x256xf32> to vector<1x256xf32>
    %310 = vector.broadcast %308 : f32 to vector<1x256xf32>
    %311 = arith.mulf %310, %309 : vector<1x256xf32>
    %312 = arith.addf %307, %311 : vector<1x256xf32>
    %c1_97 = arith.constant 1 : index
    %c28_98 = arith.constant 28 : index
    %313 = memref.load %arg2[%c1_97, %c28_98] : memref<3x32xf32, #tpu.memory_space<smem>>
    %314 = vector.extract_strided_slice %1 {offsets = [28, 0], sizes = [1, 256], strides = [1, 1]} : vector<32x256xf32> to vector<1x256xf32>
    %315 = vector.broadcast %313 : f32 to vector<1x256xf32>
    %316 = arith.mulf %315, %314 : vector<1x256xf32>
    %317 = arith.addf %312, %316 : vector<1x256xf32>
    %c1_99 = arith.constant 1 : index
    %c29_100 = arith.constant 29 : index
    %318 = memref.load %arg2[%c1_99, %c29_100] : memref<3x32xf32, #tpu.memory_space<smem>>
    %319 = vector.extract_strided_slice %1 {offsets = [29, 0], sizes = [1, 256], strides = [1, 1]} : vector<32x256xf32> to vector<1x256xf32>
    %320 = vector.broadcast %318 : f32 to vector<1x256xf32>
    %321 = arith.mulf %320, %319 : vector<1x256xf32>
    %322 = arith.addf %317, %321 : vector<1x256xf32>
    %c1_101 = arith.constant 1 : index
    %c30_102 = arith.constant 30 : index
    %323 = memref.load %arg2[%c1_101, %c30_102] : memref<3x32xf32, #tpu.memory_space<smem>>
    %324 = vector.extract_strided_slice %1 {offsets = [30, 0], sizes = [1, 256], strides = [1, 1]} : vector<32x256xf32> to vector<1x256xf32>
    %325 = vector.broadcast %323 : f32 to vector<1x256xf32>
    %326 = arith.mulf %325, %324 : vector<1x256xf32>
    %327 = arith.addf %322, %326 : vector<1x256xf32>
    %c1_103 = arith.constant 1 : index
    %c31_104 = arith.constant 31 : index
    %328 = memref.load %arg2[%c1_103, %c31_104] : memref<3x32xf32, #tpu.memory_space<smem>>
    %329 = vector.extract_strided_slice %1 {offsets = [31, 0], sizes = [1, 256], strides = [1, 1]} : vector<32x256xf32> to vector<1x256xf32>
    %330 = vector.broadcast %328 : f32 to vector<1x256xf32>
    %331 = arith.mulf %330, %329 : vector<1x256xf32>
    %332 = arith.addf %327, %331 : vector<1x256xf32>
    %c0_105 = arith.constant 0 : index
    %c1_106 = arith.constant 1 : index
    %c0_107 = arith.constant 0 : index
    %333 = vector.load %arg5[%c0_105, %c1_106, %c0_107] : memref<1x3x256xf32, #tpu.memory_space<vmem>>, vector<1x1x256xf32>
    %334 = vector.shape_cast %333 : vector<1x1x256xf32> to vector<1x256xf32>
    %335 = vector.shape_cast %332 : vector<1x256xf32> to vector<1x1x256xf32>
    tpu.vector_store %arg5[%c0_105, %c1_106, %c0_107], %335 {strides = array<i32>} : memref<1x3x256xf32, #tpu.memory_space<vmem>>, vector<1x1x256xf32>,
    %cst_108 = arith.constant 0.000000e+00 : f32
    %336 = vector.broadcast %cst_108 : f32 to vector<1x256xf32>
    %c2_109 = arith.constant 2 : index
    %337 = memref.load %arg3[%c2_109] : memref<3xf32, #tpu.memory_space<smem>>
    %338 = vector.broadcast %337 : f32 to vector<1x256xf32>
    %339 = arith.addf %336, %338 : vector<1x256xf32>
    %c2_110 = arith.constant 2 : index
    %c0_111 = arith.constant 0 : index
    %340 = memref.load %arg2[%c2_110, %c0_111] : memref<3x32xf32, #tpu.memory_space<smem>>
    %341 = vector.extract_strided_slice %1 {offsets = [0, 0], sizes = [1, 256], strides = [1, 1]} : vector<32x256xf32> to vector<1x256xf32>
    %342 = vector.broadcast %340 : f32 to vector<1x256xf32>
    %343 = arith.mulf %342, %341 : vector<1x256xf32>
    %344 = arith.addf %339, %343 : vector<1x256xf32>
    %c2_112 = arith.constant 2 : index
    %c1_113 = arith.constant 1 : index
    %345 = memref.load %arg2[%c2_112, %c1_113] : memref<3x32xf32, #tpu.memory_space<smem>>
    %346 = vector.extract_strided_slice %1 {offsets = [1, 0], sizes = [1, 256], strides = [1, 1]} : vector<32x256xf32> to vector<1x256xf32>
    %347 = vector.broadcast %345 : f32 to vector<1x256xf32>
    %348 = arith.mulf %347, %346 : vector<1x256xf32>
    %349 = arith.addf %344, %348 : vector<1x256xf32>
    %c2_114 = arith.constant 2 : index
    %c2_115 = arith.constant 2 : index
    %350 = memref.load %arg2[%c2_114, %c2_115] : memref<3x32xf32, #tpu.memory_space<smem>>
    %351 = vector.extract_strided_slice %1 {offsets = [2, 0], sizes = [1, 256], strides = [1, 1]} : vector<32x256xf32> to vector<1x256xf32>
    %352 = vector.broadcast %350 : f32 to vector<1x256xf32>
    %353 = arith.mulf %352, %351 : vector<1x256xf32>
    %354 = arith.addf %349, %353 : vector<1x256xf32>
    %c2_116 = arith.constant 2 : index
    %c3_117 = arith.constant 3 : index
    %355 = memref.load %arg2[%c2_116, %c3_117] : memref<3x32xf32, #tpu.memory_space<smem>>
    %356 = vector.extract_strided_slice %1 {offsets = [3, 0], sizes = [1, 256], strides = [1, 1]} : vector<32x256xf32> to vector<1x256xf32>
    %357 = vector.broadcast %355 : f32 to vector<1x256xf32>
    %358 = arith.mulf %357, %356 : vector<1x256xf32>
    %359 = arith.addf %354, %358 : vector<1x256xf32>
    %c2_118 = arith.constant 2 : index
    %c4_119 = arith.constant 4 : index
    %360 = memref.load %arg2[%c2_118, %c4_119] : memref<3x32xf32, #tpu.memory_space<smem>>
    %361 = vector.extract_strided_slice %1 {offsets = [4, 0], sizes = [1, 256], strides = [1, 1]} : vector<32x256xf32> to vector<1x256xf32>
    %362 = vector.broadcast %360 : f32 to vector<1x256xf32>
    %363 = arith.mulf %362, %361 : vector<1x256xf32>
    %364 = arith.addf %359, %363 : vector<1x256xf32>
    %c2_120 = arith.constant 2 : index
    %c5_121 = arith.constant 5 : index
    %365 = memref.load %arg2[%c2_120, %c5_121] : memref<3x32xf32, #tpu.memory_space<smem>>
    %366 = vector.extract_strided_slice %1 {offsets = [5, 0], sizes = [1, 256], strides = [1, 1]} : vector<32x256xf32> to vector<1x256xf32>
    %367 = vector.broadcast %365 : f32 to vector<1x256xf32>
    %368 = arith.mulf %367, %366 : vector<1x256xf32>
    %369 = arith.addf %364, %368 : vector<1x256xf32>
    %c2_122 = arith.constant 2 : index
    %c6_123 = arith.constant 6 : index
    %370 = memref.load %arg2[%c2_122, %c6_123] : memref<3x32xf32, #tpu.memory_space<smem>>
    %371 = vector.extract_strided_slice %1 {offsets = [6, 0], sizes = [1, 256], strides = [1, 1]} : vector<32x256xf32> to vector<1x256xf32>
    %372 = vector.broadcast %370 : f32 to vector<1x256xf32>
    %373 = arith.mulf %372, %371 : vector<1x256xf32>
    %374 = arith.addf %369, %373 : vector<1x256xf32>
    %c2_124 = arith.constant 2 : index
    %c7_125 = arith.constant 7 : index
    %375 = memref.load %arg2[%c2_124, %c7_125] : memref<3x32xf32, #tpu.memory_space<smem>>
    %376 = vector.extract_strided_slice %1 {offsets = [7, 0], sizes = [1, 256], strides = [1, 1]} : vector<32x256xf32> to vector<1x256xf32>
    %377 = vector.broadcast %375 : f32 to vector<1x256xf32>
    %378 = arith.mulf %377, %376 : vector<1x256xf32>
    %379 = arith.addf %374, %378 : vector<1x256xf32>
    %c2_126 = arith.constant 2 : index
    %c8_127 = arith.constant 8 : index
    %380 = memref.load %arg2[%c2_126, %c8_127] : memref<3x32xf32, #tpu.memory_space<smem>>
    %381 = vector.extract_strided_slice %1 {offsets = [8, 0], sizes = [1, 256], strides = [1, 1]} : vector<32x256xf32> to vector<1x256xf32>
    %382 = vector.broadcast %380 : f32 to vector<1x256xf32>
    %383 = arith.mulf %382, %381 : vector<1x256xf32>
    %384 = arith.addf %379, %383 : vector<1x256xf32>
    %c2_128 = arith.constant 2 : index
    %c9_129 = arith.constant 9 : index
    %385 = memref.load %arg2[%c2_128, %c9_129] : memref<3x32xf32, #tpu.memory_space<smem>>
    %386 = vector.extract_strided_slice %1 {offsets = [9, 0], sizes = [1, 256], strides = [1, 1]} : vector<32x256xf32> to vector<1x256xf32>
    %387 = vector.broadcast %385 : f32 to vector<1x256xf32>
    %388 = arith.mulf %387, %386 : vector<1x256xf32>
    %389 = arith.addf %384, %388 : vector<1x256xf32>
    %c2_130 = arith.constant 2 : index
    %c10_131 = arith.constant 10 : index
    %390 = memref.load %arg2[%c2_130, %c10_131] : memref<3x32xf32, #tpu.memory_space<smem>>
    %391 = vector.extract_strided_slice %1 {offsets = [10, 0], sizes = [1, 256], strides = [1, 1]} : vector<32x256xf32> to vector<1x256xf32>
    %392 = vector.broadcast %390 : f32 to vector<1x256xf32>
    %393 = arith.mulf %392, %391 : vector<1x256xf32>
    %394 = arith.addf %389, %393 : vector<1x256xf32>
    %c2_132 = arith.constant 2 : index
    %c11_133 = arith.constant 11 : index
    %395 = memref.load %arg2[%c2_132, %c11_133] : memref<3x32xf32, #tpu.memory_space<smem>>
    %396 = vector.extract_strided_slice %1 {offsets = [11, 0], sizes = [1, 256], strides = [1, 1]} : vector<32x256xf32> to vector<1x256xf32>
    %397 = vector.broadcast %395 : f32 to vector<1x256xf32>
    %398 = arith.mulf %397, %396 : vector<1x256xf32>
    %399 = arith.addf %394, %398 : vector<1x256xf32>
    %c2_134 = arith.constant 2 : index
    %c12_135 = arith.constant 12 : index
    %400 = memref.load %arg2[%c2_134, %c12_135] : memref<3x32xf32, #tpu.memory_space<smem>>
    %401 = vector.extract_strided_slice %1 {offsets = [12, 0], sizes = [1, 256], strides = [1, 1]} : vector<32x256xf32> to vector<1x256xf32>
    %402 = vector.broadcast %400 : f32 to vector<1x256xf32>
    %403 = arith.mulf %402, %401 : vector<1x256xf32>
    %404 = arith.addf %399, %403 : vector<1x256xf32>
    %c2_136 = arith.constant 2 : index
    %c13_137 = arith.constant 13 : index
    %405 = memref.load %arg2[%c2_136, %c13_137] : memref<3x32xf32, #tpu.memory_space<smem>>
    %406 = vector.extract_strided_slice %1 {offsets = [13, 0], sizes = [1, 256], strides = [1, 1]} : vector<32x256xf32> to vector<1x256xf32>
    %407 = vector.broadcast %405 : f32 to vector<1x256xf32>
    %408 = arith.mulf %407, %406 : vector<1x256xf32>
    %409 = arith.addf %404, %408 : vector<1x256xf32>
    %c2_138 = arith.constant 2 : index
    %c14_139 = arith.constant 14 : index
    %410 = memref.load %arg2[%c2_138, %c14_139] : memref<3x32xf32, #tpu.memory_space<smem>>
    %411 = vector.extract_strided_slice %1 {offsets = [14, 0], sizes = [1, 256], strides = [1, 1]} : vector<32x256xf32> to vector<1x256xf32>
    %412 = vector.broadcast %410 : f32 to vector<1x256xf32>
    %413 = arith.mulf %412, %411 : vector<1x256xf32>
    %414 = arith.addf %409, %413 : vector<1x256xf32>
    %c2_140 = arith.constant 2 : index
    %c15_141 = arith.constant 15 : index
    %415 = memref.load %arg2[%c2_140, %c15_141] : memref<3x32xf32, #tpu.memory_space<smem>>
    %416 = vector.extract_strided_slice %1 {offsets = [15, 0], sizes = [1, 256], strides = [1, 1]} : vector<32x256xf32> to vector<1x256xf32>
    %417 = vector.broadcast %415 : f32 to vector<1x256xf32>
    %418 = arith.mulf %417, %416 : vector<1x256xf32>
    %419 = arith.addf %414, %418 : vector<1x256xf32>
    %c2_142 = arith.constant 2 : index
    %c16_143 = arith.constant 16 : index
    %420 = memref.load %arg2[%c2_142, %c16_143] : memref<3x32xf32, #tpu.memory_space<smem>>
    %421 = vector.extract_strided_slice %1 {offsets = [16, 0], sizes = [1, 256], strides = [1, 1]} : vector<32x256xf32> to vector<1x256xf32>
    %422 = vector.broadcast %420 : f32 to vector<1x256xf32>
    %423 = arith.mulf %422, %421 : vector<1x256xf32>
    %424 = arith.addf %419, %423 : vector<1x256xf32>
    %c2_144 = arith.constant 2 : index
    %c17_145 = arith.constant 17 : index
    %425 = memref.load %arg2[%c2_144, %c17_145] : memref<3x32xf32, #tpu.memory_space<smem>>
    %426 = vector.extract_strided_slice %1 {offsets = [17, 0], sizes = [1, 256], strides = [1, 1]} : vector<32x256xf32> to vector<1x256xf32>
    %427 = vector.broadcast %425 : f32 to vector<1x256xf32>
    %428 = arith.mulf %427, %426 : vector<1x256xf32>
    %429 = arith.addf %424, %428 : vector<1x256xf32>
    %c2_146 = arith.constant 2 : index
    %c18_147 = arith.constant 18 : index
    %430 = memref.load %arg2[%c2_146, %c18_147] : memref<3x32xf32, #tpu.memory_space<smem>>
    %431 = vector.extract_strided_slice %1 {offsets = [18, 0], sizes = [1, 256], strides = [1, 1]} : vector<32x256xf32> to vector<1x256xf32>
    %432 = vector.broadcast %430 : f32 to vector<1x256xf32>
    %433 = arith.mulf %432, %431 : vector<1x256xf32>
    %434 = arith.addf %429, %433 : vector<1x256xf32>
    %c2_148 = arith.constant 2 : index
    %c19_149 = arith.constant 19 : index
    %435 = memref.load %arg2[%c2_148, %c19_149] : memref<3x32xf32, #tpu.memory_space<smem>>
    %436 = vector.extract_strided_slice %1 {offsets = [19, 0], sizes = [1, 256], strides = [1, 1]} : vector<32x256xf32> to vector<1x256xf32>
    %437 = vector.broadcast %435 : f32 to vector<1x256xf32>
    %438 = arith.mulf %437, %436 : vector<1x256xf32>
    %439 = arith.addf %434, %438 : vector<1x256xf32>
    %c2_150 = arith.constant 2 : index
    %c20_151 = arith.constant 20 : index
    %440 = memref.load %arg2[%c2_150, %c20_151] : memref<3x32xf32, #tpu.memory_space<smem>>
    %441 = vector.extract_strided_slice %1 {offsets = [20, 0], sizes = [1, 256], strides = [1, 1]} : vector<32x256xf32> to vector<1x256xf32>
    %442 = vector.broadcast %440 : f32 to vector<1x256xf32>
    %443 = arith.mulf %442, %441 : vector<1x256xf32>
    %444 = arith.addf %439, %443 : vector<1x256xf32>
    %c2_152 = arith.constant 2 : index
    %c21_153 = arith.constant 21 : index
    %445 = memref.load %arg2[%c2_152, %c21_153] : memref<3x32xf32, #tpu.memory_space<smem>>
    %446 = vector.extract_strided_slice %1 {offsets = [21, 0], sizes = [1, 256], strides = [1, 1]} : vector<32x256xf32> to vector<1x256xf32>
    %447 = vector.broadcast %445 : f32 to vector<1x256xf32>
    %448 = arith.mulf %447, %446 : vector<1x256xf32>
    %449 = arith.addf %444, %448 : vector<1x256xf32>
    %c2_154 = arith.constant 2 : index
    %c22_155 = arith.constant 22 : index
    %450 = memref.load %arg2[%c2_154, %c22_155] : memref<3x32xf32, #tpu.memory_space<smem>>
    %451 = vector.extract_strided_slice %1 {offsets = [22, 0], sizes = [1, 256], strides = [1, 1]} : vector<32x256xf32> to vector<1x256xf32>
    %452 = vector.broadcast %450 : f32 to vector<1x256xf32>
    %453 = arith.mulf %452, %451 : vector<1x256xf32>
    %454 = arith.addf %449, %453 : vector<1x256xf32>
    %c2_156 = arith.constant 2 : index
    %c23_157 = arith.constant 23 : index
    %455 = memref.load %arg2[%c2_156, %c23_157] : memref<3x32xf32, #tpu.memory_space<smem>>
    %456 = vector.extract_strided_slice %1 {offsets = [23, 0], sizes = [1, 256], strides = [1, 1]} : vector<32x256xf32> to vector<1x256xf32>
    %457 = vector.broadcast %455 : f32 to vector<1x256xf32>
    %458 = arith.mulf %457, %456 : vector<1x256xf32>
    %459 = arith.addf %454, %458 : vector<1x256xf32>
    %c2_158 = arith.constant 2 : index
    %c24_159 = arith.constant 24 : index
    %460 = memref.load %arg2[%c2_158, %c24_159] : memref<3x32xf32, #tpu.memory_space<smem>>
    %461 = vector.extract_strided_slice %1 {offsets = [24, 0], sizes = [1, 256], strides = [1, 1]} : vector<32x256xf32> to vector<1x256xf32>
    %462 = vector.broadcast %460 : f32 to vector<1x256xf32>
    %463 = arith.mulf %462, %461 : vector<1x256xf32>
    %464 = arith.addf %459, %463 : vector<1x256xf32>
    %c2_160 = arith.constant 2 : index
    %c25_161 = arith.constant 25 : index
    %465 = memref.load %arg2[%c2_160, %c25_161] : memref<3x32xf32, #tpu.memory_space<smem>>
    %466 = vector.extract_strided_slice %1 {offsets = [25, 0], sizes = [1, 256], strides = [1, 1]} : vector<32x256xf32> to vector<1x256xf32>
    %467 = vector.broadcast %465 : f32 to vector<1x256xf32>
    %468 = arith.mulf %467, %466 : vector<1x256xf32>
    %469 = arith.addf %464, %468 : vector<1x256xf32>
    %c2_162 = arith.constant 2 : index
    %c26_163 = arith.constant 26 : index
    %470 = memref.load %arg2[%c2_162, %c26_163] : memref<3x32xf32, #tpu.memory_space<smem>>
    %471 = vector.extract_strided_slice %1 {offsets = [26, 0], sizes = [1, 256], strides = [1, 1]} : vector<32x256xf32> to vector<1x256xf32>
    %472 = vector.broadcast %470 : f32 to vector<1x256xf32>
    %473 = arith.mulf %472, %471 : vector<1x256xf32>
    %474 = arith.addf %469, %473 : vector<1x256xf32>
    %c2_164 = arith.constant 2 : index
    %c27_165 = arith.constant 27 : index
    %475 = memref.load %arg2[%c2_164, %c27_165] : memref<3x32xf32, #tpu.memory_space<smem>>
    %476 = vector.extract_strided_slice %1 {offsets = [27, 0], sizes = [1, 256], strides = [1, 1]} : vector<32x256xf32> to vector<1x256xf32>
    %477 = vector.broadcast %475 : f32 to vector<1x256xf32>
    %478 = arith.mulf %477, %476 : vector<1x256xf32>
    %479 = arith.addf %474, %478 : vector<1x256xf32>
    %c2_166 = arith.constant 2 : index
    %c28_167 = arith.constant 28 : index
    %480 = memref.load %arg2[%c2_166, %c28_167] : memref<3x32xf32, #tpu.memory_space<smem>>
    %481 = vector.extract_strided_slice %1 {offsets = [28, 0], sizes = [1, 256], strides = [1, 1]} : vector<32x256xf32> to vector<1x256xf32>
    %482 = vector.broadcast %480 : f32 to vector<1x256xf32>
    %483 = arith.mulf %482, %481 : vector<1x256xf32>
    %484 = arith.addf %479, %483 : vector<1x256xf32>
    %c2_168 = arith.constant 2 : index
    %c29_169 = arith.constant 29 : index
    %485 = memref.load %arg2[%c2_168, %c29_169] : memref<3x32xf32, #tpu.memory_space<smem>>
    %486 = vector.extract_strided_slice %1 {offsets = [29, 0], sizes = [1, 256], strides = [1, 1]} : vector<32x256xf32> to vector<1x256xf32>
    %487 = vector.broadcast %485 : f32 to vector<1x256xf32>
    %488 = arith.mulf %487, %486 : vector<1x256xf32>
    %489 = arith.addf %484, %488 : vector<1x256xf32>
    %c2_170 = arith.constant 2 : index
    %c30_171 = arith.constant 30 : index
    %490 = memref.load %arg2[%c2_170, %c30_171] : memref<3x32xf32, #tpu.memory_space<smem>>
    %491 = vector.extract_strided_slice %1 {offsets = [30, 0], sizes = [1, 256], strides = [1, 1]} : vector<32x256xf32> to vector<1x256xf32>
    %492 = vector.broadcast %490 : f32 to vector<1x256xf32>
    %493 = arith.mulf %492, %491 : vector<1x256xf32>
    %494 = arith.addf %489, %493 : vector<1x256xf32>
    %c2_172 = arith.constant 2 : index
    %c31_173 = arith.constant 31 : index
    %495 = memref.load %arg2[%c2_172, %c31_173] : memref<3x32xf32, #tpu.memory_space<smem>>
    %496 = vector.extract_strided_slice %1 {offsets = [31, 0], sizes = [1, 256], strides = [1, 1]} : vector<32x256xf32> to vector<1x256xf32>
    %497 = vector.broadcast %495 : f32 to vector<1x256xf32>
    %498 = arith.mulf %497, %496 : vector<1x256xf32>
    %499 = arith.addf %494, %498 : vector<1x256xf32>
    %c0_174 = arith.constant 0 : index
    %c2_175 = arith.constant 2 : index
    %c0_176 = arith.constant 0 : index
    %500 = vector.load %arg5[%c0_174, %c2_175, %c0_176] : memref<1x3x256xf32, #tpu.memory_space<vmem>>, vector<1x1x256xf32>
    %501 = vector.shape_cast %500 : vector<1x1x256xf32> to vector<1x256xf32>
    %502 = vector.shape_cast %499 : vector<1x256xf32> to vector<1x1x256xf32>
    tpu.vector_store %arg5[%c0_174, %c2_175, %c0_176], %502 {strides = array<i32>} : memref<1x3x256xf32, #tpu.memory_space<vmem>>, vector<1x1x256xf32>,
    return
  }
  func.func @transform_0(%arg0: i32, %arg1: i32) -> (i32, i32) {
    %c0_i32 = arith.constant 0 : i32
    %c0_i32_0 = arith.constant 0 : i32
    %c0_i32_1 = arith.constant 0 : i32
    return %c0_i32, %c0_i32_0 : i32, i32
  }
  func.func @transform_1(%arg0: i32, %arg1: i32) -> i32 {
    %c0_i32 = arith.constant 0 : i32
    %c0_i32_0 = arith.constant 0 : i32
    return %c0_i32 : i32
  }
  func.func @transform_2(%arg0: i32, %arg1: i32) -> (i32, i32, i32) {
    %c0_i32 = arith.constant 0 : i32
    %c0_i32_0 = arith.constant 0 : i32
    return %arg0, %c0_i32, %arg1 : i32, i32, i32
  }
  func.func @transform_3(%arg0: i32, %arg1: i32) -> (i32, i32, i32) {
    %c0_i32 = arith.constant 0 : i32
    %c0_i32_0 = arith.constant 0 : i32
    return %arg0, %c0_i32, %arg1 : i32, i32, i32
  }
}

</mosaic_0001>

<bundles_post_ra>
// kernel: tpu_custom_call.1
= control target key start
LH: loop header
LB: loop body
LE: loop exit
PB: predicated region body
PF: predicated region fallthrough
CT: control target
= control target key end

     0   :  { %8 = vsyncpa [#allocation4], 0  ;;  %s2606_s0 = inlined_call_operand.hbm [shape: f32[3,32], index: 0, kind: input, shape index: {}]   ;;  %s2607_s1 = inlined_call_operand.vmem [shape: f32[3], index: 1, kind: input, shape index: {}]   ;;  %s2608_s2 = inlined_call_operand.hbm [shape: f32[2,32,256], index: 2, kind: input, shape index: {}]   ;;  %s2609_s3 = inlined_call_operand.vmem [shape: f32[2,3,256], index: 3, kind: output, shape index: {}]  }
   0x1   :  { %9 = vsyncpa [#allocation5], 0 }
   0x2   :  { %10 = vsyncpa [#allocation3], 0 }
   0x3   :  { %12 = vsyncpa [#allocation3 + $0x1], 0  ;;  %s1872_s12 = smov 0   ;;  %s1874_s13 = smov 0  }
   0x4   :  { %s1876_s14 = smov 0   ;;  %s1878_s15 = smov 0  }
   0x5   :  { %s1880_s16 = smov 0   ;;  %s1882_s17 = smov 0  }
   0x6 LB: > { %s1523_s18 = sadd.s32 4294967295, %s1844_s17   ;;  %s81_s19 = sadd.s32 1, %s1832_s14  ;;  %s1844_s17 = sphi %s1882_s17, %s18_s17   ;;  %s1840_s16 = sphi %s1880_s16, %s2626_s16   ;;  %s1836_s15 = sphi %s1878_s15, %s2625_s15   ;;  %s1832_s14 = sphi %s1876_s14, %s2624_s14   ;;  %s1828_s13 = sphi %s1874_s13, %s2623_s13   ;;  %s1824_s12 = sphi %s1872_s12, %s2622_s12  }
   0x7   : > { %p88_p0 = scmp.ne.s32.totalorder %s1832_s14, %s1828_s13  ;;  %p89_p1 = scmp.eq.s32.totalorder %s1844_s17, 0 }
   0x8   : > { %p94_p2 = scmp.ne.s32.totalorder %s1828_s13, %s1824_s12  ;;  %p1906_p3 = scmp.eq.s32.totalorder %s1523_s18, 0 }
   0x9   : > { %p90_p4 = por %p89_p1, %p88_p0  ;;  %p1525_p5 = scmp.ge.s32.totalorder %s1844_s17, 1 }
   0xa   : > { %s2613_s20 = scalar_select %p1906_p3, 1, 0 }
   0xb   : > { %p1913_p6 = por %p1906_p3, %p94_p2  ;;  %p133_p7 = scmp.lt.s32.totalorder %s1844_s17, 3 }
   0xc   : > { %p1664_p9 = scmp.lt.s32.totalorder %s1844_s17, 2  ;;  %s155_s25 = sshll.u32 %s2607_s1, 4  ;;  %s156_s25 = int_to_ptr.vmem [resolvable:$true] %s155_s25 }
   0xd   : > { %s2614_s21 = scalar_select %p1913_p6, 1, 0 }
   0xe   : > { %p1918_p8 = pnand %p1525_p5, %p133_p7  ;;  %p1928_p11 = pnand %p1664_p9, %p90_p4 }
   0xf   : > { %s30_s28 = sadd.s32 1, %s1840_s16  ;;  %s1728_s4 = scalar_lea.hbm %s2606_s0, 64 }
  0x10   : > { %p1651_p10 = pneg %p1918_p8  ;;  %p1729_p13 = scmp.ne.s32.totalorder %s2606_s0, %s1728_s4 }
  0x11   : > { %p1735_p4 = scmp.lt.u32.totalorder %s1728_s4, %s2606_s0 }
  0x12   : > { %p1934_p12 = pnand %p1651_p10, %p1906_p3 }
  0x14   : > { %p1730_p0 = pneg %p1934_p12 }
  0x16   : > { %p1731_p1 = pnand %p1730_p0, %p1729_p13 }
  0x18   : > { %p1732_p2 = pneg %p1731_p1 }
  0x1a   : > { %p1737_p5 = pnand %p1735_p4, %p1732_p2 }
  0x1c   : > { %1740 = shalt.err (!%p1737_p5)
}
  0x1d   : > { %s1846_s9 = smov [#allocation2]   ;;  %s1741_s12 = scalar_lea.vmem %s156_s25, 16 }
  0x1e   : > { %1654 = dma.hbm_to_smem (!%p1934_p12), %s2606_s0, 64, %s1846_s9, [#allocation4]  }
  0x1f   : > { %p1742_p7 = scmp.ne.s32.totalorder %s156_s25, %s1741_s12  ;;  %p1749_p6 = scmp.lt.s32.totalorder %s156_s25, %s156_s25 }
  0x20   : > { %p1750_p13 = scmp.lt.s32.totalorder %s1741_s12, %s1741_s12 }
  0x21   : > { %p1744_p9 = pnand %p1742_p7, %p1730_p0 }
  0x22   : > { %p1751_p1 = por %p1750_p13, %p1749_p6 }
  0x23   : > { %p1745_p10 = pneg %p1744_p9 }
  0x25   : > { %p1752_p3 = pnand %p1751_p1, %p1745_p10 }
  0x27   : > { %1755 = shalt.err (!%p1752_p3)
}
  0x28   : > { %s1847_s18 = smov [#allocation6]   ;;  %p32_p2 = scmp.ge.s32.totalorder %s30_s28, 2 }
  0x29   : > { %1657 = dma.vmem_to_smem (!%p1934_p12), %s156_s25, 16, %s1847_s18, [#allocation5]  }
  0x2a   : > { %s166_s23 = sand.u32 1, %s1832_s14   ;;  %s2628_s28 = smov (%p32_p2, %s30_s28), 0 }
  0x2b   : > { %s1529_s24 = sshll.u32 %s166_s23, 6  ;;  %s1639_s29 = sshll.u32 %s1840_s16, 10 }
  0x2c   : > { %s76_s30 = ssub.s32 %s1840_s16, %s2628_s28  ;;  %s1966_s27 = scalar_lea.hbm %s2608_s2, %s1639_s29 }
  0x2d   : > { %p79_p3 = scmp.eq.s32.totalorder %s76_s30, 0  ;;  %s170_s25 = scalar_lea.vmem [#allocation7], %s1529_s24 }
  0x2e   : > { %s179_s6 = sshll.u32 %s170_s25, 4  ;;  %s1975_s8 = scalar_lea.sflag [#allocation3], %s166_s23  ;;  %s1968_s6 = int_to_ptr.vmem [resolvable:$true] %s179_s6 }
  0x2f   : > { %s1973_s7 = scalar_select %p79_p3, %s1832_s14, %s81_s19  }
  0x30   : > { %s1756_s9 = scalar_lea.hbm %s1966_s27, 1024  ;;  %p1758_p12 = pneg %p1928_p11 }
  0x31   : > { %p1757_p6 = scmp.ne.s32.totalorder %s1966_s27, %s1756_s9  ;;  %s1761_s12 = scalar_lea.hbm %s2608_s2, 2048 }
  0x32   : > { %p1762_p5 = scmp.lt.u32.totalorder %s1966_s27, %s2608_s2  ;;  %p1763_p7 = scmp.lt.u32.totalorder %s1761_s12, %s1756_s9 }
  0x33   : > { %p1759_p0 = pnand %p1758_p12, %p1757_p6  ;;  %p1765_p10 = scmp.lt.u32.totalorder %s1756_s9, %s1966_s27 }
  0x34   : > { %p1764_p9 = por %p1763_p7, %p1762_p5 }
  0x35   : > { %p1760_p4 = pneg %p1759_p0 }
  0x36   : > { %p1766_p13 = por %p1765_p10, %p1764_p9 }
  0x38   : > { %p1767_p1 = pnand %p1766_p13, %p1760_p4 }
  0x3a   : > { %1770 = shalt.err (!%p1767_p1)
}
  0x3b   : > { %s1771_s19 = scalar_lea.vmem %s1968_s6, 1024  ;;  %s1848_s23 = smov [#allocation7]  }
  0x3c   : > { %p1772_p2 = scmp.ne.s32.totalorder %s1968_s6, %s1771_s19  ;;  %s1776_s29 = sshll.u32 %s1848_s23, 4  ;;  %s1777_s29 = int_to_ptr.vmem [resolvable:$false] %s1776_s29 }
  0x3d   : > { %s1778_s30 = scalar_lea.vmem %s1777_s29, 2048  ;;  %p1779_p0 = scmp.lt.s32.totalorder %s1968_s6, %s1777_s29 }
  0x3e   : > { %p1774_p3 = pnand %p1772_p2, %p1758_p12  ;;  %p1780_p5 = scmp.lt.s32.totalorder %s1778_s30, %s1771_s19 }
  0x40   : > { %p1775_p6 = pneg %p1774_p3  ;;  %p1781_p7 = por %p1780_p5, %p1779_p0 }
  0x42   : > { %p1782_p9 = pnand %p1781_p7, %p1775_p6 }
  0x44   : > { %1785 = shalt.err (!%p1782_p9)
}
  0x45   : > { %s1849_s4 = smov 256   ;;  %s1850_s5 = smov 16  }
  0x46   : > { %1661 = dma.hbm_to_vmem [thread:$0]  (!%p1928_p11), %s1966_s27, 1024, %s1968_s6, %s1975_s8, %s1849_s4, %s1849_s4, %s1850_s5  }
  0x47   : > { %191 = sbr.rel (%p1918_p8) target bundleno = 276 (0x114), region = 32  ;;  %p2618_p12 = scmp.ne.s32.totalorder (!%p1918_p8), %s2613_s20, 0 }
  0x4e   : > { %1811 = dma.done.wait (%p2618_p12), [#allocation4], 64  }
  0x4f   : > { %1813 = vsyncadd (%p2618_p12), [#allocation4], 4294967232 }
  0x50   : > { %1815 = dma.done.wait (%p2618_p12), [#allocation5], 16  }
  0x51   : > { %1817 = vsyncadd (%p2618_p12), [#allocation5], 4294967280  ;;  %s201_s25 = sand.u32 1, %s1828_s13   ;;  %p2619_p8 = scmp.ne.s32.totalorder %s2614_s21, 0 }
  0x52   : > { %s1535_s26 = sshll.u32 %s201_s25, 6  ;;  %s202_s27 = scalar_lea.sflag [#allocation3], %s201_s25 }
  0x53   : > { %s2014_s6 = scalar_lea.vmem [#allocation7], %s1535_s26 }
  0x54   : > { %1819 = dma.done.wait (%p2619_p8), %s202_s27, 1024  }
  0x55   : > { %1821 = vsyncadd (%p2619_p8), %s202_s27, 4294966272 }
  0x56   : > { %210 = sfence }
  0x57   : > { %s252_s22 = sld [smem:[#allocation6]]  ;;  %v621_v0 = vlaneseq  ;;  %s1538_s20 = sld [smem:[#allocation2 + $0x1]]  ;;  %v1851_v1 = vmov 1966171168   ;;  %v2021_v3 = vld [vmem:[%s2014_s6] sm:$0xff]  ;;  %v2024_v4 = vld [vmem:[%s2014_s6 + $0x8] sm:$0xff] }
  0x58   : > { %s255_s8 = sld [smem:[#allocation2]]  ;;  %s1539_s9 = sld [smem:[#allocation2 + $0x2]]  ;;  %v619_v2 = vunpack.c.l.s4 %v1851_v1  ;;  %v2060_v42 = vld [vmem:[%s2014_s6 + $0x10] sm:$0xff]  ;;  %v2063_v43 = vld [vmem:[%s2014_s6 + $0x18] sm:$0xff] }
  0x59   : > { %s1540_s10 = sld [smem:[#allocation2 + $0x3]]  ;;  %s1541_s11 = sld [smem:[#allocation2 + $0x4]]  ;;  %v622_v6 = vshrl.u32 %v621_v0, 7  ;;  %vm2313_vm0 = vcmp.lt.s32.totalorder %v621_v0, 256 }
  0x5a   : > { %v620_v5 = vunpack.c.0.s8 %v619_v2  ;;  %s2027_s21 = sld [smem:[#allocation2 + $0x5]]  ;;  %s2029_s12 = sld [smem:[#allocation2 + $0x6]] }
  0x5b   : > { %s2033_s18 = sld [smem:[#allocation2 + $0x7]]  ;;  %s2035_s24 = sld [smem:[#allocation2 + $0x8]] }
  0x5c   : > { %v2037_v13 = vsub.s32 %v620_v5, %v622_v6  ;;  %s2047_s19 = sld [smem:[#allocation2 + $0x9]]  ;;  %s2049_s23 = sld [smem:[#allocation2 + $0xa]] }
  0x5d   : > { %v253_v7 = vstv %s252_s22  ;;  %v262_v11 = vstv %s1538_s20  ;;  %s2053_s29 = sld [smem:[#allocation2 + $0xb]]  ;;  %s2055_s30 = sld [smem:[#allocation2 + $0xc]] }
  0x5e   : > { %v256_v8 = vstv %s255_s8  ;;  %v274_v12 = vstv %s1539_s9  ;;  %v263_v16 = vmul.f32 %v262_v11, %v2021_v3  ;;  %v264_v17 = vmul.f32 %v262_v11, %v2024_v4  ;;  %s2071_s4 = sld [smem:[#allocation2 + $0xd]]  ;;  %s2073_s5 = sld [smem:[#allocation2 + $0xe]] }
  0x5f   : > { %v257_v9 = vmul.f32 %v256_v8, %v2021_v3  ;;  %v258_v10 = vmul.f32 %v256_v8, %v2024_v4  ;;  %v275_v18 = vmul.f32 %v274_v12, %v2021_v3  ;;  %v276_v19 = vmul.f32 %v274_v12, %v2024_v4  ;;  %s2081_s25 = sld [smem:[#allocation2 + $0xf]]  ;;  %s2083_s26 = sld [smem:[#allocation2 + $0x10]] }
  0x60   : > { %v286_v20 = vstv %s1540_s10  ;;  %v298_v21 = vstv %s1541_s11  ;;  %v267_v22 = vrot.slane %v263_v16, 1  ;;  %v268_v23 = vrot.slane %v264_v17, 1  ;;  %s2091_s27 = sld [smem:[#allocation2 + $0x11]]  ;;  %s2093_s22 = sld [smem:[#allocation2 + $0x12]] }
  0x61   : > { %v259_v14 = vadd.f32 %v257_v9, %v253_v7  ;;  %v260_v15 = vadd.f32 %v258_v10, %v253_v7  ;;  %v287_v24 = vmul.f32 %v286_v20, %v2021_v3  ;;  %v288_v25 = vmul.f32 %v286_v20, %v2024_v4  ;;  %s2099_s8 = sld [smem:[#allocation2 + $0x13]]  ;;  %s2101_s20 = sld [smem:[#allocation2 + $0x14]] }
  0x62   : > { %v279_v26 = vrot.slane %v275_v18, 2  ;;  %v280_v27 = vrot.slane %v276_v19, 2  ;;  %v299_v28 = vmul.f32 %v298_v21, %v2021_v3  ;;  %v300_v29 = vmul.f32 %v298_v21, %v2024_v4  ;;  %s2115_s9 = sld [smem:[#allocation2 + $0x15]]  ;;  %s2117_s10 = sld [smem:[#allocation2 + $0x16]] }
  0x63   : > { %v271_v30 = vadd.f32 %v267_v22, %v259_v14  ;;  %v272_v31 = vadd.f32 %v268_v23, %v260_v15  ;;  %v291_v32 = vrot.slane %v287_v24, 3  ;;  %v292_v33 = vrot.slane %v288_v25, 3  ;;  %s2133_s11 = sld [smem:[#allocation2 + $0x17]]  ;;  %p235_p11 = scmp.lt.s32.totalorder %s1836_s15, 1 }
  0x64   : > { %v303_v34 = vrot.slane %v299_v28, 4  ;;  %v304_v35 = vrot.slane %v300_v29, 4  ;;  %v310_v36 = vstv %s2027_s21  ;;  %v322_v37 = vstv %s2029_s12  ;;  %s2135_s21 = sld [smem:[#allocation2 + $0x18]]  ;;  %s2143_s12 = sld [smem:[#allocation2 + $0x19]] }
  0x65   : > { %v283_v38 = vadd.f32 %v279_v26, %v271_v30  ;;  %v284_v39 = vadd.f32 %v280_v27, %v272_v31  ;;  %v311_v40 = vmul.f32 %v310_v36, %v2021_v3  ;;  %v312_v41 = vmul.f32 %v310_v36, %v2024_v4  ;;  %v2108_v36 = vld [vmem:[%s2014_s6 + $0x20] sm:$0xff]  ;;  %s2630_s15 = smov (!%p235_p11, %s1836_s15), 1 }
  0x66   : > { %v323_v44 = vmul.f32 %v322_v37, %v2021_v3  ;;  %v324_v45 = vmul.f32 %v322_v37, %v2024_v4  ;;  %v334_v46 = vstv %s2033_s18  ;;  %v346_v47 = vstv %s2035_s24  ;;  %v2111_v37 = vld [vmem:[%s2014_s6 + $0x28] sm:$0xff]  ;;  %s2145_s18 = sld [smem:[#allocation2 + $0x1a]]  ;;  %s2163_s24 = sld [smem:[#allocation2 + $0x1b]] }
  0x67   : > { %v295_v48 = vadd.f32 %v291_v32, %v283_v38  ;;  %v296_v49 = vadd.f32 %v292_v33, %v284_v39  ;;  %v315_v50 = vrot.slane %v311_v40, 5  ;;  %v316_v51 = vrot.slane %v312_v41, 5 }
  0x68   : > { %v327_v52 = vrot.slane %v323_v44, 6  ;;  %v328_v53 = vrot.slane %v324_v45, 6  ;;  %v335_v54 = vmul.f32 %v334_v46, %v2021_v3  ;;  %v336_v55 = vmul.f32 %v334_v46, %v2024_v4 }
  0x69   : > { %v307_v56 = vadd.f32 %v303_v34, %v295_v48  ;;  %v308_v57 = vadd.f32 %v304_v35, %v296_v49  ;;  %v347_v58 = vmul.f32 %v346_v47, %v2060_v42  ;;  %v348_v59 = vmul.f32 %v346_v47, %v2063_v43 }
  0x6a   : > { %v339_v60 = vrot.slane %v335_v54, 7  ;;  %v340_v61 = vrot.slane %v336_v55, 7  ;;  %v352_v62 = vstv %s2047_s19  ;;  %v364_v63 = vstv %s2049_s23  ;;  %s2165_s19 = sld [smem:[#allocation2 + $0x1c]]  ;;  %s2185_s23 = sld [smem:[#allocation2 + $0x1d]] }
  0x6b   : > { %v319_v1 = vadd.f32 %v315_v50, %v307_v56  ;;  %v320_v2 = vadd.f32 %v316_v51, %v308_v57  ;;  %v353_v5 = vmul.f32 %v352_v62, %v2060_v42  ;;  %v354_v6 = vmul.f32 %v352_v62, %v2063_v43 }
  0x6c   : > { %v365_v7 = vmul.f32 %v364_v63, %v2060_v42  ;;  %v366_v8 = vmul.f32 %v364_v63, %v2063_v43  ;;  %v376_v9 = vstv %s2053_s29  ;;  %v388_v10 = vstv %s2055_s30  ;;  %s2187_s29 = sld [smem:[#allocation2 + $0x1e]]  ;;  %s2205_s30 = sld [smem:[#allocation2 + $0x1f]] }
  0x6d   : > { %v331_v11 = vadd.f32 %v327_v52, %v319_v1  ;;  %v332_v12 = vadd.f32 %v328_v53, %v320_v2  ;;  %v357_v14 = vrot.slane %v353_v5, 1  ;;  %v358_v15 = vrot.slane %v354_v6, 1 }
  0x6e   : > { %v369_v16 = vrot.slane %v365_v7, 2  ;;  %v370_v17 = vrot.slane %v366_v8, 2  ;;  %v377_v18 = vmul.f32 %v376_v9, %v2060_v42  ;;  %v378_v19 = vmul.f32 %v376_v9, %v2063_v43 }
  0x6f   : > { %v343_v20 = vadd.f32 %v339_v60, %v331_v11  ;;  %v344_v21 = vadd.f32 %v340_v61, %v332_v12  ;;  %v389_v22 = vmul.f32 %v388_v10, %v2060_v42  ;;  %v390_v23 = vmul.f32 %v388_v10, %v2063_v43 }
  0x70   : > { %v381_v24 = vrot.slane %v377_v18, 3  ;;  %v382_v25 = vrot.slane %v378_v19, 3  ;;  %v400_v26 = vstv %s2071_s4  ;;  %v412_v27 = vstv %s2073_s5  ;;  %s2207_s4 = sld [smem:[#allocation6 + $0x1]]  ;;  %s2221_s5 = sld [smem:[#allocation2 + $0x80]] }
  0x71   : > { %v349_v28 = vadd.f32 %v347_v58, %v343_v20  ;;  %v350_v29 = vadd.f32 %v348_v59, %v344_v21  ;;  %v393_v30 = vrot.slane %v389_v22, 4  ;;  %v394_v31 = vrot.slane %v390_v23, 4 }
  0x72   : > { %v401_v32 = vmul.f32 %v400_v26, %v2060_v42  ;;  %v402_v33 = vmul.f32 %v400_v26, %v2063_v43  ;;  %v413_v34 = vmul.f32 %v412_v27, %v2060_v42  ;;  %v414_v35 = vmul.f32 %v412_v27, %v2063_v43 }
  0x73   : > { %v361_v38 = vadd.f32 %v357_v14, %v349_v28  ;;  %v362_v39 = vadd.f32 %v358_v15, %v350_v29  ;;  %v424_v40 = vstv %s2081_s25  ;;  %v436_v41 = vstv %s2083_s26  ;;  %v2168_v28 = vld [vmem:[%s2014_s6 + $0x30] sm:$0xff]  ;;  %v2171_v29 = vld [vmem:[%s2014_s6 + $0x38] sm:$0xff]  ;;  %s2223_s25 = sld [smem:[#allocation2 + $0x81]]  ;;  %s2239_s26 = sld [smem:[#allocation2 + $0x82]] }
  0x74   : > { %v405_v44 = vrot.slane %v401_v32, 5  ;;  %v406_v45 = vrot.slane %v402_v33, 5  ;;  %v417_v46 = vrot.slane %v413_v34, 6  ;;  %v418_v47 = vrot.slane %v414_v35, 6 }
  0x75   : > { %v373_v48 = vadd.f32 %v369_v16, %v361_v38  ;;  %v374_v49 = vadd.f32 %v370_v17, %v362_v39  ;;  %v425_v50 = vmul.f32 %v424_v40, %v2060_v42  ;;  %v426_v51 = vmul.f32 %v424_v40, %v2063_v43 }
  0x76   : > { %v437_v52 = vmul.f32 %v436_v41, %v2108_v36  ;;  %v438_v53 = vmul.f32 %v436_v41, %v2111_v37  ;;  %v442_v54 = vstv %s2091_s27  ;;  %v454_v55 = vstv %s2093_s22  ;;  %s2245_s27 = sld [smem:[#allocation2 + $0x83]]  ;;  %s2273_s22 = sld [smem:[#allocation2 + $0x84]] }
  0x77   : > { %v385_v56 = vadd.f32 %v381_v24, %v373_v48  ;;  %v386_v57 = vadd.f32 %v382_v25, %v374_v49  ;;  %v429_v58 = vrot.slane %v425_v50, 7  ;;  %v430_v59 = vrot.slane %v426_v51, 7 }
  0x78   : > { %v443_v60 = vmul.f32 %v442_v54, %v2108_v36  ;;  %v444_v61 = vmul.f32 %v442_v54, %v2111_v37  ;;  %v2128_v62 = vmul.f32 %v454_v55, %v2108_v36  ;;  %v2131_v63 = vmul.f32 %v454_v55, %v2111_v37 }
  0x79   : > { %v397_v1 = vadd.f32 %v393_v30, %v385_v56  ;;  %v398_v2 = vadd.f32 %v394_v31, %v386_v57  ;;  %v466_v5 = vstv %s2099_s8  ;;  %v478_v6 = vstv %s2101_s20  ;;  %s2275_s8 = sld [smem:[#allocation2 + $0x85]]  ;;  %s2291_s20 = sld [smem:[#allocation2 + $0x86]] }
  0x7a   : > { %v447_v7 = vrot.slane %v443_v60, 1  ;;  %v448_v8 = vrot.slane %v444_v61, 1  ;;  %v459_v9 = vrot.slane %v2128_v62, 2  ;;  %v460_v10 = vrot.slane %v2131_v63, 2 }
  0x7b   : > { %v409_v11 = vadd.f32 %v405_v44, %v397_v1  ;;  %v410_v12 = vadd.f32 %v406_v45, %v398_v2  ;;  %v467_v14 = vmul.f32 %v466_v5, %v2108_v36  ;;  %v468_v15 = vmul.f32 %v466_v5, %v2111_v37 }
  0x7c   : > { %v2148_v16 = vmul.f32 %v478_v6, %v2108_v36  ;;  %v2151_v17 = vmul.f32 %v478_v6, %v2111_v37  ;;  %v490_v18 = vstv %s2115_s9  ;;  %v502_v19 = vstv %s2117_s10  ;;  %s2293_s9 = sld [smem:[#allocation2 + $0x87]]  ;;  %s2299_s10 = sld [smem:[#allocation2 + $0x88]] }
  0x7d   : > { %v421_v20 = vadd.f32 %v417_v46, %v409_v11  ;;  %v422_v21 = vadd.f32 %v418_v47, %v410_v12  ;;  %v471_v22 = vrot.slane %v467_v14, 3  ;;  %v472_v23 = vrot.slane %v468_v15, 3 }
  0x7e   : > { %v483_v24 = vrot.slane %v2148_v16, 4  ;;  %v484_v25 = vrot.slane %v2151_v17, 4  ;;  %v2158_v26 = vmul.f32 %v490_v18, %v2108_v36  ;;  %v2161_v27 = vmul.f32 %v490_v18, %v2111_v37 }
  0x7f   : > { %v433_v30 = vadd.f32 %v429_v58, %v421_v20  ;;  %v434_v31 = vadd.f32 %v430_v59, %v422_v21  ;;  %v2174_v32 = vmul.f32 %v502_v19, %v2108_v36  ;;  %v2177_v33 = vmul.f32 %v502_v19, %v2111_v37 }
  0x80   : > { %v495_v34 = vrot.slane %v2158_v26, 5  ;;  %v496_v35 = vrot.slane %v2161_v27, 5  ;;  %v514_v38 = vstv %s2133_s11  ;;  %v526_v39 = vstv %s2135_s21  ;;  %s2301_s11 = sld [smem:[#allocation2 + $0x89]]  ;;  %s2310_s21 = sld [smem:[#allocation2 + $0x8a]] }
  0x81   : > { %v439_v40 = vadd.f32 %v437_v52, %v433_v30  ;;  %v440_v41 = vadd.f32 %v438_v53, %v434_v31  ;;  %v507_v44 = vrot.slane %v2174_v32, 6  ;;  %v508_v45 = vrot.slane %v2177_v33, 6 }
  0x82   : > { %v515_v46 = vmul.f32 %v514_v38, %v2108_v36  ;;  %v516_v47 = vmul.f32 %v514_v38, %v2111_v37  ;;  %v2192_v48 = vmul.f32 %v526_v39, %v2168_v28  ;;  %v2195_v49 = vmul.f32 %v526_v39, %v2171_v29 }
  0x83   : > { %v451_v50 = vadd.f32 %v447_v7, %v439_v40  ;;  %v452_v51 = vadd.f32 %v448_v8, %v440_v41  ;;  %v532_v52 = vstv %s2143_s12  ;;  %v544_v53 = vstv %s2145_s18  ;;  %s2319_s12 = sld [smem:[#allocation2 + $0x8b]]  ;;  %s2334_s18 = sld [smem:[#allocation2 + $0x8c]] }
  0x84   : > { %v519_v54 = vrot.slane %v515_v46, 7  ;;  %v520_v55 = vrot.slane %v516_v47, 7  ;;  %v2200_v56 = vmul.f32 %v532_v52, %v2168_v28  ;;  %v2203_v57 = vmul.f32 %v532_v52, %v2171_v29 }
  0x85   : > { %v463_v58 = vadd.f32 %v459_v9, %v451_v50  ;;  %v464_v59 = vadd.f32 %v460_v10, %v452_v51  ;;  %v2210_v60 = vmul.f32 %v544_v53, %v2168_v28  ;;  %v2213_v61 = vmul.f32 %v544_v53, %v2171_v29 }
  0x86   : > { %v537_v62 = vrot.slane %v2200_v56, 1  ;;  %v538_v63 = vrot.slane %v2203_v57, 1  ;;  %v556_v1 = vstv %s2163_s24  ;;  %v568_v2 = vstv %s2165_s19  ;;  %s2342_s24 = sld [smem:[#allocation2 + $0x8d]]  ;;  %s2344_s19 = sld [smem:[#allocation2 + $0x8e]] }
  0x87   : > { %v475_v5 = vadd.f32 %v471_v22, %v463_v58  ;;  %v476_v6 = vadd.f32 %v472_v23, %v464_v59  ;;  %v549_v7 = vrot.slane %v2210_v60, 2  ;;  %v550_v8 = vrot.slane %v2213_v61, 2 }
  0x88   : > { %v2226_v9 = vmul.f32 %v556_v1, %v2168_v28  ;;  %v2229_v10 = vmul.f32 %v556_v1, %v2171_v29  ;;  %v2232_v11 = vmul.f32 %v568_v2, %v2168_v28  ;;  %v2235_v12 = vmul.f32 %v568_v2, %v2171_v29 }
  0x89   : > { %v487_v14 = vadd.f32 %v483_v24, %v475_v5  ;;  %v488_v15 = vadd.f32 %v484_v25, %v476_v6  ;;  %v580_v16 = vstv %s2185_s23  ;;  %v592_v17 = vstv %s2187_s29  ;;  %s1640_s23 = sshll.u32 %s2630_s15, 3  ;;  %s2354_s15 = sld [smem:[#allocation2 + $0x8f]] }
  0x8a   : > { %v561_v18 = vrot.slane %v2226_v9, 3  ;;  %v562_v19 = vrot.slane %v2229_v10, 3  ;;  %v573_v20 = vrot.slane %v2232_v11, 4  ;;  %v574_v21 = vrot.slane %v2235_v12, 4  ;;  %s2356_s29 = sld [smem:[#allocation2 + $0x90]] }
  0x8b   : > { %v499_v22 = vadd.f32 %v495_v34, %v487_v14  ;;  %v500_v23 = vadd.f32 %v496_v35, %v488_v15  ;;  %v2248_v24 = vmul.f32 %v580_v16, %v2168_v28  ;;  %v2251_v25 = vmul.f32 %v580_v16, %v2171_v29 }
  0x8c   : > { %v2254_v26 = vmul.f32 %v592_v17, %v2168_v28  ;;  %v2257_v27 = vmul.f32 %v592_v17, %v2171_v29  ;;  %v604_v30 = vstv %s2205_s30  ;;  %v639_v31 = vstv %s2207_s4  ;;  %s2452_s30 = sld [smem:[#allocation2 + $0x101]]  ;;  %s2460_s4 = sld [smem:[#allocation2 + $0x102]] }
  0x8d   : > { %v511_v32 = vadd.f32 %v507_v44, %v499_v22  ;;  %v512_v33 = vadd.f32 %v508_v45, %v500_v23  ;;  %v585_v34 = vrot.slane %v2248_v24, 5  ;;  %v586_v35 = vrot.slane %v2251_v25, 5 }
  0x8e   : > { %v597_v38 = vrot.slane %v2254_v26, 6  ;;  %v598_v39 = vrot.slane %v2257_v27, 6  ;;  %v2266_v40 = vmul.f32 %v604_v30, %v2168_v28  ;;  %v2269_v41 = vmul.f32 %v604_v30, %v2171_v29 }
  0x8f   : > { %v523_v46 = vadd.f32 %v519_v54, %v511_v32  ;;  %v524_v47 = vadd.f32 %v520_v55, %v512_v33  ;;  %v642_v44 = vstv %s2221_s5  ;;  %v648_v45 = vstv %s2223_s25  ;;  %s2361_s5 = scalar_lea.vmem %s2609_s3, %s1640_s23  ;;  %s2369_s25 = sld [smem:[#allocation2 + $0x91]] }
  0x90   : > { %v609_v50 = vrot.slane %v2266_v40, 7  ;;  %v610_v51 = vrot.slane %v2269_v41, 7  ;;  %v643_v52 = vmul.f32 %v642_v44, %v2021_v3  ;;  %v644_v53 = vmul.f32 %v642_v44, %v2024_v4  ;;  %s2442_s23 = sld [smem:[#allocation2 + $0x9f]] }
  0x91   : > { %v529_v56 = vadd.f32 %v2192_v48, %v523_v46  ;;  %v530_v54 = vadd.f32 %v2195_v49, %v524_v47  ;;  %v649_v55 = vmul.f32 %v648_v45, %v2021_v3  ;;  %v650_v57 = vmul.f32 %v648_v45, %v2024_v4 }
  0x92   : > { %v645_v58 = vadd.f32 %v643_v52, %v639_v31  ;;  %v646_v59 = vadd.f32 %v644_v53, %v639_v31  ;;  %v660_v60 = vstv %s2239_s26  ;;  %v672_v61 = vstv %s2245_s27  ;;  %s2371_s26 = sld [smem:[#allocation2 + $0x92]]  ;;  %s2380_s27 = sld [smem:[#allocation2 + $0x93]] }
  0x93   : > { %v541_v1 = vadd.f32 %v537_v62, %v529_v56  ;;  %v542_v2 = vadd.f32 %v538_v63, %v530_v54  ;;  %v653_v5 = vrot.slane %v649_v55, 1  ;;  %v654_v6 = vrot.slane %v650_v57, 1 }
  0x94   : > { %v661_v9 = vmul.f32 %v660_v60, %v2021_v3  ;;  %v662_v10 = vmul.f32 %v660_v60, %v2024_v4  ;;  %v673_v48 = vmul.f32 %v672_v61, %v2021_v3  ;;  %v674_v49 = vmul.f32 %v672_v61, %v2024_v4 }
  0x95   : > { %v553_v14 = vadd.f32 %v549_v7, %v541_v1  ;;  %v554_v15 = vadd.f32 %v550_v8, %v542_v2  ;;  %v657_v62 = vadd.f32 %v653_v5, %v645_v58  ;;  %v658_v63 = vadd.f32 %v654_v6, %v646_v59 }
  0x96   : > { %v665_v16 = vrot.slane %v661_v9, 2  ;;  %v666_v17 = vrot.slane %v662_v10, 2  ;;  %v677_v22 = vrot.slane %v673_v48, 3  ;;  %v678_v23 = vrot.slane %v674_v49, 3 }
  0x97   : > { %v565_v24 = vadd.f32 %v561_v18, %v553_v14  ;;  %v566_v25 = vadd.f32 %v562_v19, %v554_v15  ;;  %v684_v30 = vstv %s2273_s22  ;;  %v696_v31 = vstv %s2275_s8  ;;  %s2382_s22 = sld [smem:[#allocation2 + $0x94]]  ;;  %s2390_s8 = sld [smem:[#allocation2 + $0x95]] }
  0x98   : > { %v669_v32 = vadd.f32 %v665_v16, %v657_v62  ;;  %v670_v33 = vadd.f32 %v666_v17, %v658_v63  ;;  %v685_v46 = vmul.f32 %v684_v30, %v2021_v3  ;;  %v686_v47 = vmul.f32 %v684_v30, %v2024_v4 }
  0x99   : > { %v577_v7 = vadd.f32 %v573_v20, %v565_v24  ;;  %v578_v8 = vadd.f32 %v574_v21, %v566_v25  ;;  %v697_v18 = vmul.f32 %v696_v31, %v2021_v3  ;;  %v698_v19 = vmul.f32 %v696_v31, %v2024_v4 }
  0x9a   : > { %v681_v44 = vadd.f32 %v677_v22, %v669_v32  ;;  %v682_v45 = vadd.f32 %v678_v23, %v670_v33  ;;  %v689_v52 = vrot.slane %v685_v46, 4  ;;  %v690_v53 = vrot.slane %v686_v47, 4 }
  0x9b   : > { %v589_v56 = vadd.f32 %v585_v34, %v577_v7  ;;  %v590_v11 = vadd.f32 %v586_v35, %v578_v8  ;;  %v701_v20 = vrot.slane %v697_v18, 5  ;;  %v702_v54 = vrot.slane %v698_v19, 5 }
  0x9c   : > { %v693_v21 = vadd.f32 %v689_v52, %v681_v44  ;;  %v694_v55 = vadd.f32 %v690_v53, %v682_v45  ;;  %v708_v57 = vstv %s2291_s20  ;;  %v720_v58 = vstv %s2293_s9  ;;  %s2392_s20 = sld [smem:[#allocation2 + $0x96]]  ;;  %s2404_s9 = sld [smem:[#allocation2 + $0x97]] }
  0x9d   : > { %v601_v34 = vadd.f32 %v597_v38, %v589_v56  ;;  %v602_v0 = vadd.f32 %v598_v39, %v590_v11  ;;  %v709_v35 = vmul.f32 %v708_v57, %v2021_v3  ;;  %v710_v59 = vmul.f32 %v708_v57, %v2024_v4 }
  0x9e   : > { %v705_v60 = vadd.f32 %v701_v20, %v693_v21  ;;  %v706_v61 = vadd.f32 %v702_v54, %v694_v55  ;;  %v721_v1 = vmul.f32 %v720_v58, %v2021_v3  ;;  %v722_v2 = vmul.f32 %v720_v58, %v2024_v4 }
  0x9f   : > { %v613_v26 = vadd.f32 %v609_v50, %v601_v34  ;;  %v614_v27 = vadd.f32 %v610_v51, %v602_v0  ;;  %v713_v38 = vrot.slane %v709_v35, 6  ;;  %v714_v39 = vrot.slane %v710_v59, 6 }
  0xa0   : > { %v725_v5 = vrot.slane %v721_v1, 7  ;;  %v726_v6 = vrot.slane %v722_v2, 7  ;;  %v732_v9 = vstv %s2299_s10  ;;  %v738_v10 = vstv %s2301_s11  ;;  %s2406_s10 = sld [smem:[#allocation2 + $0x98]]  ;;  %s2412_s11 = sld [smem:[#allocation2 + $0x99]] }
  0xa1   : > { %v617_v3 = vcombine.low %v613_v26, %v614_v27  ;;  %v717_v4 = vadd.f32 %v713_v38, %v705_v60  ;;  %v718_v48 = vadd.f32 %v714_v39, %v706_v61  ;;  %v733_v40 = vmul.f32 %v732_v9, %v2060_v42 }
  0xa2   : > { %v734_v41 = vmul.f32 %v732_v9, %v2063_v43  ;;  %v739_v50 = vmul.f32 %v738_v10, %v2060_v42  ;;  %v740_v51 = vmul.f32 %v738_v10, %v2063_v43  ;;  %v750_v49 = vstv %s2310_s21  ;;  %s2414_s21 = sld [smem:[#allocation2 + $0x9a]] }
  0xa3   : > { %v624_v14 = vrot.slane %v617_v3, %v2037_v13  ;;  %v729_v15 = vadd.f32 %v725_v5, %v717_v4  ;;  %v730_v62 = vadd.f32 %v726_v6, %v718_v48  ;;  %v751_v63 = vmul.f32 %v750_v49, %v2060_v42 }
  0xa4   : > { %v743_v16 = vrot.slane %v739_v50, 1  ;;  %v744_v17 = vrot.slane %v740_v51, 1  ;;  %v752_v22 = vmul.f32 %v750_v49, %v2063_v43  ;;  %v762_v23 = vstv %s2319_s12  ;;  %s2422_s12 = sld [smem:[#allocation2 + $0x9b]] }
  0xa5   : > { %v631_v24 = vrot.slane %v624_v14, %v2037_v13  ;;  %v735_v25 = vadd.f32 %v733_v40, %v729_v15  ;;  %v736_v30 = vadd.f32 %v734_v41, %v730_v62  ;;  %v755_v31 = vrot.slane %v751_v63, 2 }
  0xa6   : > { %v756_v32 = vrot.slane %v752_v22, 2  ;;  %v763_v33 = vmul.f32 %v762_v23, %v2060_v42  ;;  %v764_v46 = vmul.f32 %v762_v23, %v2063_v43  ;;  %v774_v47 = vstv %s2334_s18  ;;  %s2424_s18 = sld [smem:[#allocation2 + $0x9c]] }
  0xa7   : > { %637 = vst.msk [vmem:[%s2361_s5] ss:$4 sm:$0x3] %vm2313_vm0, %v631_v24  ;;  %v747_v7 = vadd.f32 %v743_v16, %v735_v25  ;;  %v748_v8 = vadd.f32 %v744_v17, %v736_v30  ;;  %v775_v18 = vmul.f32 %v774_v47, %v2060_v42  ;;  %v776_v19 = vmul.f32 %v774_v47, %v2063_v43 }
  0xa8   : > { %v767_v44 = vrot.slane %v763_v33, 3  ;;  %v768_v45 = vrot.slane %v764_v46, 3  ;;  %v786_v52 = vstv %s2342_s24  ;;  %v798_v53 = vstv %s2344_s19  ;;  %s2430_s24 = sld [smem:[#allocation2 + $0x9d]]  ;;  %s2432_s19 = sld [smem:[#allocation2 + $0x9e]] }
  0xa9   : > { %v759_v56 = vadd.f32 %v755_v31, %v747_v7  ;;  %v760_v11 = vadd.f32 %v756_v32, %v748_v8  ;;  %v779_v20 = vrot.slane %v775_v18, 4  ;;  %v780_v54 = vrot.slane %v776_v19, 4 }
  0xaa   : > { %v787_v21 = vmul.f32 %v786_v52, %v2060_v42  ;;  %v788_v55 = vmul.f32 %v786_v52, %v2063_v43  ;;  %v799_v57 = vmul.f32 %v798_v53, %v2060_v42  ;;  %v800_v58 = vmul.f32 %v798_v53, %v2063_v43 }
  0xab   : > { %v771_v34 = vadd.f32 %v767_v44, %v759_v56  ;;  %v772_v0 = vadd.f32 %v768_v45, %v760_v11  ;;  %v810_v35 = vstv %s2354_s15  ;;  %v822_v59 = vstv %s2356_s29  ;;  %s2444_s15 = sld [smem:[#allocation6 + $0x2]]  ;;  %s2450_s29 = sld [smem:[#allocation2 + $0x100]] }
  0xac   : > { %v791_v60 = vrot.slane %v787_v21, 5  ;;  %v792_v61 = vrot.slane %v788_v55, 5  ;;  %v803_v1 = vrot.slane %v799_v57, 6  ;;  %v804_v2 = vrot.slane %v800_v58, 6 }
  0xad   : > { %v783_v26 = vadd.f32 %v779_v20, %v771_v34  ;;  %v784_v27 = vadd.f32 %v780_v54, %v772_v0  ;;  %v811_v38 = vmul.f32 %v810_v35, %v2060_v42  ;;  %v812_v39 = vmul.f32 %v810_v35, %v2063_v43 }
  0xae   : > { %v823_v5 = vmul.f32 %v822_v59, %v2108_v36  ;;  %v824_v6 = vmul.f32 %v822_v59, %v2111_v37  ;;  %v828_v9 = vstv %s2369_s25  ;;  %v840_v10 = vstv %s2371_s26  ;;  %s2462_s25 = sld [smem:[#allocation2 + $0x103]]  ;;  %s2474_s26 = sld [smem:[#allocation2 + $0x104]] }
  0xaf   : > { %v795_v3 = vadd.f32 %v791_v60, %v783_v26  ;;  %v796_v4 = vadd.f32 %v792_v61, %v784_v27  ;;  %v815_v48 = vrot.slane %v811_v38, 7  ;;  %v816_v40 = vrot.slane %v812_v39, 7 }
  0xb0   : > { %v829_v41 = vmul.f32 %v828_v9, %v2108_v36  ;;  %v830_v50 = vmul.f32 %v828_v9, %v2111_v37  ;;  %v841_v42 = vmul.f32 %v840_v10, %v2108_v36  ;;  %v842_v43 = vmul.f32 %v840_v10, %v2111_v37 }
  0xb1   : > { %v807_v51 = vadd.f32 %v803_v1, %v795_v3  ;;  %v808_v49 = vadd.f32 %v804_v2, %v796_v4  ;;  %v852_v14 = vstv %s2380_s27  ;;  %v864_v15 = vstv %s2382_s22  ;;  %s2476_s27 = sld [smem:[#allocation2 + $0x105]]  ;;  %s2488_s22 = sld [smem:[#allocation2 + $0x106]] }
  0xb2   : > { %v833_v62 = vrot.slane %v829_v41, 1  ;;  %v834_v63 = vrot.slane %v830_v50, 1  ;;  %v845_v16 = vrot.slane %v841_v42, 2  ;;  %v846_v17 = vrot.slane %v842_v43, 2 }
  0xb3   : > { %v819_v22 = vadd.f32 %v815_v48, %v807_v51  ;;  %v820_v23 = vadd.f32 %v816_v40, %v808_v49  ;;  %v853_v24 = vmul.f32 %v852_v14, %v2108_v36  ;;  %v854_v25 = vmul.f32 %v852_v14, %v2111_v37 }
  0xb4   : > { %v865_v30 = vmul.f32 %v864_v15, %v2108_v36  ;;  %v866_v31 = vmul.f32 %v864_v15, %v2111_v37  ;;  %v876_v32 = vstv %s2390_s8  ;;  %v888_v33 = vstv %s2392_s20  ;;  %s2490_s8 = sld [smem:[#allocation2 + $0x107]]  ;;  %s2492_s20 = sld [smem:[#allocation2 + $0x108]] }
  0xb5   : > { %v825_v46 = vadd.f32 %v823_v5, %v819_v22  ;;  %v826_v47 = vadd.f32 %v824_v6, %v820_v23  ;;  %v857_v7 = vrot.slane %v853_v24, 3  ;;  %v858_v8 = vrot.slane %v854_v25, 3 }
  0xb6   : > { %v869_v18 = vrot.slane %v865_v30, 4  ;;  %v870_v19 = vrot.slane %v866_v31, 4  ;;  %v877_v44 = vmul.f32 %v876_v32, %v2108_v36  ;;  %v878_v45 = vmul.f32 %v876_v32, %v2111_v37 }
  0xb7   : > { %v837_v52 = vadd.f32 %v833_v62, %v825_v46  ;;  %v838_v53 = vadd.f32 %v834_v63, %v826_v47  ;;  %v889_v56 = vmul.f32 %v888_v33, %v2108_v36  ;;  %v890_v11 = vmul.f32 %v888_v33, %v2111_v37 }
  0xb8   : > { %v881_v20 = vrot.slane %v877_v44, 5  ;;  %v882_v54 = vrot.slane %v878_v45, 5  ;;  %v900_v21 = vstv %s2404_s9  ;;  %v912_v55 = vstv %s2406_s10  ;;  %s2497_s9 = sld [smem:[#allocation2 + $0x109]]  ;;  %s2500_s10 = sld [smem:[#allocation2 + $0x10a]] }
  0xb9   : > { %v849_v57 = vadd.f32 %v845_v16, %v837_v52  ;;  %v850_v58 = vadd.f32 %v846_v17, %v838_v53  ;;  %v893_v34 = vrot.slane %v889_v56, 6  ;;  %v894_v0 = vrot.slane %v890_v11, 6 }
  0xba   : > { %v901_v35 = vmul.f32 %v900_v21, %v2108_v36  ;;  %v902_v59 = vmul.f32 %v900_v21, %v2111_v37  ;;  %v913_v60 = vmul.f32 %v912_v55, %v2168_v28  ;;  %v914_v61 = vmul.f32 %v912_v55, %v2171_v29 }
  0xbb   : > { %v861_v1 = vadd.f32 %v857_v7, %v849_v57  ;;  %v862_v2 = vadd.f32 %v858_v8, %v850_v58  ;;  %v918_v26 = vstv %s2412_s11  ;;  %v930_v27 = vstv %s2414_s21  ;;  %s2502_s11 = sld [smem:[#allocation2 + $0x10b]]  ;;  %s2504_s21 = sld [smem:[#allocation2 + $0x10c]] }
  0xbc   : > { %v905_v38 = vrot.slane %v901_v35, 7  ;;  %v906_v39 = vrot.slane %v902_v59, 7  ;;  %v919_v5 = vmul.f32 %v918_v26, %v2168_v28  ;;  %v920_v6 = vmul.f32 %v918_v26, %v2171_v29  ;;  %v2480_v35 = vld [vmem:[%s2014_s6 + $0x8] sm:$0xff] }
  0xbd   : > { %v873_v36 = vadd.f32 %v869_v18, %v861_v1  ;;  %v874_v37 = vadd.f32 %v870_v19, %v862_v2  ;;  %v931_v9 = vmul.f32 %v930_v27, %v2168_v28  ;;  %v932_v10 = vmul.f32 %v930_v27, %v2171_v29 }
  0xbe   : > { %v923_v3 = vrot.slane %v919_v5, 1  ;;  %v924_v4 = vrot.slane %v920_v6, 1  ;;  %v942_v48 = vstv %s2422_s12  ;;  %v954_v40 = vstv %s2424_s18  ;;  %s2512_s12 = sld [smem:[#allocation2 + $0x10d]]  ;;  %s2517_s18 = sld [smem:[#allocation2 + $0x10e]] }
  0xbf   : > { %v885_v41 = vadd.f32 %v881_v20, %v873_v36  ;;  %v886_v50 = vadd.f32 %v882_v54, %v874_v37  ;;  %v935_v42 = vrot.slane %v931_v9, 2  ;;  %v936_v43 = vrot.slane %v932_v10, 2 }
  0xc0   : > { %v943_v51 = vmul.f32 %v942_v48, %v2168_v28  ;;  %v944_v49 = vmul.f32 %v942_v48, %v2171_v29  ;;  %v955_v14 = vmul.f32 %v954_v40, %v2168_v28  ;;  %v956_v15 = vmul.f32 %v954_v40, %v2171_v29 }
  0xc1   : > { %v897_v62 = vadd.f32 %v893_v34, %v885_v41  ;;  %v898_v63 = vadd.f32 %v894_v0, %v886_v50  ;;  %v966_v16 = vstv %s2430_s24  ;;  %v978_v17 = vstv %s2432_s19  ;;  %v1720_v34 = vld [vmem:[%s2014_s6] sm:$0xff]  ;;  %s2523_s24 = sld [smem:[#allocation2 + $0x10f]]  ;;  %s2528_s19 = sld [smem:[#allocation2 + $0x110]] }
  0xc2   : > { %v947_v22 = vrot.slane %v943_v51, 3  ;;  %v948_v23 = vrot.slane %v944_v49, 3  ;;  %v959_v24 = vrot.slane %v955_v14, 4  ;;  %v960_v25 = vrot.slane %v956_v15, 4 }
  0xc3   : > { %v909_v30 = vadd.f32 %v905_v38, %v897_v62  ;;  %v910_v31 = vadd.f32 %v906_v39, %v898_v63  ;;  %v967_v32 = vmul.f32 %v966_v16, %v2168_v28  ;;  %v968_v33 = vmul.f32 %v966_v16, %v2171_v29 }
  0xc4   : > { %v979_v46 = vmul.f32 %v978_v17, %v2168_v28  ;;  %v980_v47 = vmul.f32 %v978_v17, %v2171_v29  ;;  %v990_v7 = vstv %s2442_s23  ;;  %v1022_v8 = vstv %s2444_s15  ;;  %s2530_s23 = sld [smem:[#allocation2 + $0x111]]  ;;  %s2532_s15 = sld [smem:[#allocation2 + $0x112]] }
  0xc5   : > { %v915_v18 = vadd.f32 %v913_v60, %v909_v30  ;;  %v916_v19 = vadd.f32 %v914_v61, %v910_v31  ;;  %v971_v44 = vrot.slane %v967_v32, 5  ;;  %v972_v45 = vrot.slane %v968_v33, 5 }
  0xc6   : > { %v983_v52 = vrot.slane %v979_v46, 6  ;;  %v984_v53 = vrot.slane %v980_v47, 6  ;;  %v991_v56 = vmul.f32 %v990_v7, %v2168_v28  ;;  %v992_v11 = vmul.f32 %v990_v7, %v2171_v29 }
  0xc7   : > { %v927_v20 = vadd.f32 %v923_v3, %v915_v18  ;;  %v928_v54 = vadd.f32 %v924_v4, %v916_v19  ;;  %v1025_v21 = vstv %s2450_s29  ;;  %v1031_v55 = vstv %s2452_s30  ;;  %s2536_s29 = sld [smem:[#allocation2 + $0x113]]  ;;  %s2538_s30 = sld [smem:[#allocation2 + $0x114]] }
  0xc8   : > { %v995_v57 = vrot.slane %v991_v56, 7  ;;  %v996_v58 = vrot.slane %v992_v11, 7  ;;  %v1026_v0 = vmul.f32 %v1720_v34, %v1025_v21  ;;  %v1027_v28 = vmul.f32 %v2480_v35, %v1025_v21 }
  0xc9   : > { %v939_v59 = vadd.f32 %v935_v42, %v927_v20  ;;  %v940_v29 = vadd.f32 %v936_v43, %v928_v54  ;;  %v1032_v60 = vmul.f32 %v1720_v34, %v1031_v55  ;;  %v1033_v61 = vmul.f32 %v2480_v35, %v1031_v55 }
  0xca   : > { %v1028_v1 = vadd.f32 %v1026_v0, %v1022_v8  ;;  %v1029_v2 = vadd.f32 %v1027_v28, %v1022_v8  ;;  %v1043_v26 = vstv %s2460_s4  ;;  %v1055_v27 = vstv %s2462_s25  ;;  %s2542_s4 = sld [smem:[#allocation2 + $0x115]]  ;;  %s2546_s25 = sld [smem:[#allocation2 + $0x116]] }
  0xcb   : > { %v951_v38 = vadd.f32 %v947_v22, %v939_v59  ;;  %v952_v39 = vadd.f32 %v948_v23, %v940_v29  ;;  %v1036_v5 = vrot.slane %v1032_v60, 1  ;;  %v1037_v6 = vrot.slane %v1033_v61, 1  ;;  %v1722_v29 = vld [vmem:[%s2014_s6 + $0x10] sm:$0xff] }
  0xcc   : > { %v1044_v36 = vmul.f32 %v1720_v34, %v1043_v26  ;;  %v1045_v37 = vmul.f32 %v2480_v35, %v1043_v26  ;;  %v1056_v9 = vmul.f32 %v1720_v34, %v1055_v27  ;;  %v1057_v10 = vmul.f32 %v2480_v35, %v1055_v27 }
  0xcd   : > { %v963_v3 = vadd.f32 %v959_v24, %v951_v38  ;;  %v964_v4 = vadd.f32 %v960_v25, %v952_v39  ;;  %v1040_v48 = vadd.f32 %v1036_v5, %v1028_v1  ;;  %v1041_v40 = vadd.f32 %v1037_v6, %v1029_v2 }
  0xce   : > { %v1048_v41 = vrot.slane %v1044_v36, 2  ;;  %v1049_v50 = vrot.slane %v1045_v37, 2  ;;  %v1060_v42 = vrot.slane %v1056_v9, 3  ;;  %v1061_v43 = vrot.slane %v1057_v10, 3 }
  0xcf   : > { %v975_v51 = vadd.f32 %v971_v44, %v963_v3  ;;  %v976_v49 = vadd.f32 %v972_v45, %v964_v4  ;;  %v1067_v14 = vstv %s2474_s26  ;;  %v1079_v15 = vstv %s2476_s27  ;;  %s2550_s26 = sld [smem:[#allocation2 + $0x117]]  ;;  %s2555_s27 = sld [smem:[#allocation2 + $0x119]] }
  0xd0   : > { %v1052_v62 = vadd.f32 %v1048_v41, %v1040_v48  ;;  %v1053_v63 = vadd.f32 %v1049_v50, %v1041_v40  ;;  %v1068_v16 = vmul.f32 %v1720_v34, %v1067_v14  ;;  %v1069_v17 = vmul.f32 %v2480_v35, %v1067_v14 }
  0xd1   : > { %v987_v22 = vadd.f32 %v983_v52, %v975_v51  ;;  %v988_v23 = vadd.f32 %v984_v53, %v976_v49  ;;  %v1080_v24 = vmul.f32 %v1720_v34, %v1079_v15  ;;  %v1081_v25 = vmul.f32 %v2480_v35, %v1079_v15 }
  0xd2   : > { %v1064_v30 = vadd.f32 %v1060_v42, %v1052_v62  ;;  %v1065_v31 = vadd.f32 %v1061_v43, %v1053_v63  ;;  %v1072_v32 = vrot.slane %v1068_v16, 4  ;;  %v1073_v33 = vrot.slane %v1069_v17, 4 }
  0xd3   : > { %v999_v46 = vadd.f32 %v995_v57, %v987_v22  ;;  %v1000_v47 = vadd.f32 %v996_v58, %v988_v23  ;;  %v1084_v7 = vrot.slane %v1080_v24, 5  ;;  %v1085_v8 = vrot.slane %v1081_v25, 5 }
  0xd4   : > { %v1076_v18 = vadd.f32 %v1072_v32, %v1064_v30  ;;  %v1077_v19 = vadd.f32 %v1073_v33, %v1065_v31  ;;  %v1091_v44 = vstv %s2488_s22  ;;  %v1103_v45 = vstv %s2490_s8  ;;  %s2557_s22 = sld [smem:[#allocation2 + $0x118]]  ;;  %s2560_s8 = sld [smem:[#allocation2 + $0x11a]] }
  0xd5   : > { %v1003_v52 = vcombine.low %v999_v46, %v1000_v47  ;;  %v1092_v53 = vmul.f32 %v1720_v34, %v1091_v44  ;;  %v1093_v56 = vmul.f32 %v2480_v35, %v1091_v44  ;;  %v1104_v11 = vmul.f32 %v1720_v34, %v1103_v45  ;;  %v1723_v34 = vld [vmem:[%s2014_s6 + $0x18] sm:$0xff] }
  0xd6   : > { %v1088_v20 = vadd.f32 %v1084_v7, %v1076_v18  ;;  %v1089_v54 = vadd.f32 %v1085_v8, %v1077_v19  ;;  %v1105_v21 = vmul.f32 %v2480_v35, %v1103_v45  ;;  %v1115_v55 = vstv %s2492_s20  ;;  %s2563_s20 = sld [smem:[#allocation2 + $0x11b]] }
  0xd7   : > { %v1010_v57 = vrot.slane %v1003_v52, %v2037_v13  ;;  %v1096_v58 = vrot.slane %v1092_v53, 6  ;;  %v1097_v0 = vrot.slane %v1093_v56, 6  ;;  %v1108_v28 = vrot.slane %v1104_v11, 7 }
  0xd8   : > { %v1109_v59 = vrot.slane %v1105_v21, 7  ;;  %v1116_v60 = vmul.f32 %v1722_v29, %v1115_v55  ;;  %v1117_v61 = vmul.f32 %v1723_v34, %v1115_v55  ;;  %v1121_v1 = vstv %s2497_s9  ;;  %v1724_v21 = vld [vmem:[%s2014_s6 + $0x20] sm:$0xff]  ;;  %s2565_s9 = sld [smem:[#allocation2 + $0x11c]] }
  0xd9   : > { %v1017_v35 = vrot.slane %v1010_v57, %v2037_v13  ;;  %v1100_v2 = vadd.f32 %v1096_v58, %v1088_v20  ;;  %v1101_v26 = vadd.f32 %v1097_v0, %v1089_v54  ;;  %v1122_v27 = vmul.f32 %v1722_v29, %v1121_v1  ;;  %v1725_v57 = vld [vmem:[%s2014_s6 + $0x28] sm:$0xff] }
  0xda   : > { %v1123_v38 = vmul.f32 %v1723_v34, %v1121_v1  ;;  %v1133_v39 = vstv %s2500_s10  ;;  %v1145_v5 = vstv %s2502_s11  ;;  %v1157_v6 = vstv %s2504_s21  ;;  %s2568_s10 = sld [smem:[#allocation2 + $0x11d]]  ;;  %s2574_s11 = sld [smem:[#allocation2 + $0x11e]] }
  0xdb   : > { %1602 = vst.msk [vmem:[%s2361_s5 + $0x1] ss:$4 sm:$0x3] %vm2313_vm0, %v1017_v35  ;;  %v1112_v36 = vadd.f32 %v1108_v28, %v1100_v2  ;;  %v1113_v37 = vadd.f32 %v1109_v59, %v1101_v26  ;;  %v1126_v9 = vrot.slane %v1122_v27, 1  ;;  %v1134_v10 = vmul.f32 %v1722_v29, %v1133_v39  ;;  %s2577_s21 = sld [smem:[#allocation2 + $0x11f]] }
  0xdc   : > { %v1127_v3 = vrot.slane %v1123_v38, 1  ;;  %v1135_v4 = vmul.f32 %v1723_v34, %v1133_v39  ;;  %v1146_v48 = vmul.f32 %v1722_v29, %v1145_v5  ;;  %v1147_v40 = vmul.f32 %v1723_v34, %v1145_v5 }
  0xdd   : > { %v1118_v41 = vadd.f32 %v1116_v60, %v1112_v36  ;;  %v1119_v50 = vadd.f32 %v1117_v61, %v1113_v37  ;;  %v1138_v42 = vrot.slane %v1134_v10, 2  ;;  %v1158_v43 = vmul.f32 %v1722_v29, %v1157_v6 }
  0xde   : > { %v1139_v51 = vrot.slane %v1135_v4, 2  ;;  %v1150_v49 = vrot.slane %v1146_v48, 3  ;;  %v1151_v14 = vrot.slane %v1147_v40, 3  ;;  %v1159_v15 = vmul.f32 %v1723_v34, %v1157_v6 }
  0xdf   : > { %v1130_v62 = vadd.f32 %v1126_v9, %v1118_v41  ;;  %v1131_v63 = vadd.f32 %v1127_v3, %v1119_v50  ;;  %v1162_v16 = vrot.slane %v1158_v43, 4  ;;  %v1169_v17 = vstv %s2512_s12 }
  0xe0   : > { %v1163_v22 = vrot.slane %v1159_v15, 4  ;;  %v1170_v23 = vmul.f32 %v1722_v29, %v1169_v17  ;;  %v1171_v24 = vmul.f32 %v1723_v34, %v1169_v17  ;;  %v1181_v25 = vstv %s2517_s18 }
  0xe1   : > { %v1142_v30 = vadd.f32 %v1138_v42, %v1130_v62  ;;  %v1143_v31 = vadd.f32 %v1139_v51, %v1131_v63  ;;  %v1182_v32 = vmul.f32 %v1722_v29, %v1181_v25  ;;  %v1183_v33 = vmul.f32 %v1723_v34, %v1181_v25 }
  0xe2   : > { %v1174_v46 = vrot.slane %v1170_v23, 5  ;;  %v1193_v47 = vstv %s2523_s24  ;;  %v1175_v18 = vrot.slane %v1171_v24, 5  ;;  %v1205_v19 = vstv %s2528_s19 }
  0xe3   : > { %v1154_v7 = vadd.f32 %v1150_v49, %v1142_v30  ;;  %v1155_v8 = vadd.f32 %v1151_v14, %v1143_v31  ;;  %v1186_v44 = vrot.slane %v1182_v32, 6  ;;  %v1187_v45 = vrot.slane %v1183_v33, 6 }
  0xe4   : > { %v1194_v52 = vmul.f32 %v1722_v29, %v1193_v47  ;;  %v1195_v53 = vmul.f32 %v1723_v34, %v1193_v47  ;;  %v1211_v20 = vstv %s2530_s23  ;;  %v1223_v54 = vstv %s2532_s15 }
  0xe5   : > { %v1166_v56 = vadd.f32 %v1162_v16, %v1154_v7  ;;  %v1167_v11 = vadd.f32 %v1163_v22, %v1155_v8  ;;  %v1212_v55 = vmul.f32 %v1724_v21, %v1211_v20  ;;  %v1213_v58 = vmul.f32 %v1725_v57, %v1211_v20 }
  0xe6   : > { %v1198_v59 = vrot.slane %v1194_v52, 7  ;;  %v1199_v60 = vrot.slane %v1195_v53, 7  ;;  %v1206_v29 = vmul.f32 %v1724_v21, %v1205_v19  ;;  %v1224_v34 = vmul.f32 %v1724_v21, %v1223_v54  ;;  %v1726_v53 = vld [vmem:[%s2014_s6 + $0x30] sm:$0xff] }
  0xe7   : > { %v1178_v0 = vadd.f32 %v1174_v46, %v1166_v56  ;;  %v1179_v28 = vadd.f32 %v1175_v18, %v1167_v11  ;;  %v1225_v61 = vmul.f32 %v1725_v57, %v1223_v54  ;;  %v1235_v1 = vstv %s2536_s29  ;;  %v1727_v11 = vld [vmem:[%s2014_s6 + $0x38] sm:$0xff] }
  0xe8   : > { %v1207_v26 = vmul.f32 %v1725_v57, %v1205_v19  ;;  %v1247_v27 = vstv %s2538_s30  ;;  %v1216_v38 = vrot.slane %v1212_v55, 1  ;;  %v1217_v39 = vrot.slane %v1213_v58, 1 }
  0xe9   : > { %v1190_v35 = vadd.f32 %v1186_v44, %v1178_v0  ;;  %v1191_v2 = vadd.f32 %v1187_v45, %v1179_v28  ;;  %v1236_v5 = vmul.f32 %v1724_v21, %v1235_v1  ;;  %v1237_v37 = vmul.f32 %v1725_v57, %v1235_v1 }
  0xea   : > { %v1259_v9 = vstv %s2542_s4  ;;  %v1228_v10 = vrot.slane %v1224_v34, 2  ;;  %v1229_v3 = vrot.slane %v1225_v61, 2  ;;  %v1248_v4 = vmul.f32 %v1724_v21, %v1247_v27 }
  0xeb   : > { %v1202_v6 = vadd.f32 %v1198_v59, %v1190_v35  ;;  %v1203_v36 = vadd.f32 %v1199_v60, %v1191_v2  ;;  %v1249_v41 = vmul.f32 %v1725_v57, %v1247_v27  ;;  %v1271_v50 = vstv %s2546_s25 }
  0xec   : > { %v1240_v42 = vrot.slane %v1236_v5, 3  ;;  %v1260_v43 = vmul.f32 %v1724_v21, %v1259_v9  ;;  %v1261_v51 = vmul.f32 %v1725_v57, %v1259_v9  ;;  %v1241_v15 = vrot.slane %v1237_v37, 3 }
  0xed   : > { %v1208_v48 = vadd.f32 %v1206_v29, %v1202_v6  ;;  %v1209_v40 = vadd.f32 %v1207_v26, %v1203_v36  ;;  %v1283_v62 = vstv %s2550_s26  ;;  %v1252_v63 = vrot.slane %v1248_v4, 4 }
  0xee   : > { %v1272_v16 = vmul.f32 %v1724_v21, %v1271_v50  ;;  %v1253_v23 = vrot.slane %v1249_v41, 4  ;;  %v1273_v24 = vmul.f32 %v1725_v57, %v1271_v50  ;;  %v1264_v25 = vrot.slane %v1260_v43, 5 }
  0xef   : > { %v1220_v49 = vadd.f32 %v1216_v38, %v1208_v48  ;;  %v1221_v14 = vadd.f32 %v1217_v39, %v1209_v40  ;;  %v1265_v30 = vrot.slane %v1261_v51, 5  ;;  %v1284_v31 = vmul.f32 %v1724_v21, %v1283_v62 }
  0xf0   : > { %v1285_v46 = vmul.f32 %v1725_v57, %v1283_v62  ;;  %v1301_v47 = vstv %s2555_s27  ;;  %v1276_v7 = vrot.slane %v1272_v16, 6  ;;  %v1295_v8 = vstv %s2557_s22 }
  0xf1   : > { %v1232_v17 = vadd.f32 %v1228_v10, %v1220_v49  ;;  %v1233_v22 = vadd.f32 %v1229_v3, %v1221_v14  ;;  %v1277_v44 = vrot.slane %v1273_v24, 6  ;;  %v1313_v45 = vstv %s2560_s8 }
  0xf2   : > { %v1288_v52 = vrot.slane %v1284_v31, 7  ;;  %v1302_v56 = vmul.f32 %v1726_v53, %v1301_v47  ;;  %v1303_v20 = vmul.f32 %v1727_v11, %v1301_v47  ;;  %v1289_v55 = vrot.slane %v1285_v46, 7 }
  0xf3   : > { %v1244_v32 = vadd.f32 %v1240_v42, %v1232_v17  ;;  %v1245_v33 = vadd.f32 %v1241_v15, %v1233_v22  ;;  %v1325_v57 = vstv %s2563_s20  ;;  %v1296_v58 = vmul.f32 %v1726_v53, %v1295_v8 }
  0xf4   : > { %v1297_v0 = vmul.f32 %v1727_v11, %v1295_v8  ;;  %v1314_v28 = vmul.f32 %v1726_v53, %v1313_v45  ;;  %v1315_v29 = vmul.f32 %v1727_v11, %v1313_v45  ;;  %v1337_v34 = vstv %s2565_s9 }
  0xf5   : > { %v1256_v18 = vadd.f32 %v1252_v63, %v1244_v32  ;;  %v1257_v19 = vadd.f32 %v1253_v23, %v1245_v33  ;;  %v1306_v61 = vrot.slane %v1302_v56, 1  ;;  %v1307_v1 = vrot.slane %v1303_v20, 1 }
  0xf6   : > { %v1326_v35 = vmul.f32 %v1726_v53, %v1325_v57  ;;  %v1327_v27 = vmul.f32 %v1727_v11, %v1325_v57  ;;  %v1349_v38 = vstv %s2568_s10  ;;  %v1338_v39 = vmul.f32 %v1726_v53, %v1337_v34 }
  0xf7   : > { %v1268_v54 = vadd.f32 %v1264_v25, %v1256_v18  ;;  %v1269_v21 = vadd.f32 %v1265_v30, %v1257_v19  ;;  %v1339_v5 = vmul.f32 %v1727_v11, %v1337_v34  ;;  %v1318_v37 = vrot.slane %v1314_v28, 2 }
  0xf8   : > { %v1319_v9 = vrot.slane %v1315_v29, 2  ;;  %v1350_v10 = vmul.f32 %v1726_v53, %v1349_v38  ;;  %v1351_v3 = vmul.f32 %v1727_v11, %v1349_v38  ;;  %v1361_v4 = vstv %s2574_s11 }
  0xf9   : > { %v1280_v59 = vadd.f32 %v1276_v7, %v1268_v54  ;;  %v1281_v60 = vadd.f32 %v1277_v44, %v1269_v21  ;;  %v1330_v41 = vrot.slane %v1326_v35, 3  ;;  %v1331_v50 = vrot.slane %v1327_v27, 3 }
  0xfa   : > { %v1342_v42 = vrot.slane %v1338_v39, 4  ;;  %v1343_v43 = vrot.slane %v1339_v5, 4  ;;  %v1373_v51 = vstv %s2577_s21  ;;  %v1362_v15 = vmul.f32 %v1726_v53, %v1361_v4 }
  0xfb   : > { %v1292_v2 = vadd.f32 %v1288_v52, %v1280_v59  ;;  %v1293_v26 = vadd.f32 %v1289_v55, %v1281_v60  ;;  %v1363_v62 = vmul.f32 %v1727_v11, %v1361_v4  ;;  %v1354_v63 = vrot.slane %v1350_v10, 5 }
  0xfc   : > { %v1355_v16 = vrot.slane %v1351_v3, 5  ;;  %v1374_v23 = vmul.f32 %v1726_v53, %v1373_v51  ;;  %v1375_v24 = vmul.f32 %v1727_v11, %v1373_v51  ;;  %v1366_v31 = vrot.slane %v1362_v15, 6 }
  0xfd   : > { %v1298_v6 = vadd.f32 %v1296_v58, %v1292_v2  ;;  %v1299_v36 = vadd.f32 %v1297_v0, %v1293_v26  ;;  %v1367_v32 = vrot.slane %v1363_v62, 6 }
  0xfe   : > { %v1378_v47 = vrot.slane %v1374_v23, 7  ;;  %v1379_v7 = vrot.slane %v1375_v24, 7 }
  0xff   : > { %v1310_v48 = vadd.f32 %v1306_v61, %v1298_v6  ;;  %v1311_v40 = vadd.f32 %v1307_v1, %v1299_v36 }
 0x101   : > { %v1322_v49 = vadd.f32 %v1318_v37, %v1310_v48  ;;  %v1323_v14 = vadd.f32 %v1319_v9, %v1311_v40 }
 0x103   : > { %v1334_v17 = vadd.f32 %v1330_v41, %v1322_v49  ;;  %v1335_v22 = vadd.f32 %v1331_v50, %v1323_v14 }
 0x105   : > { %v1346_v25 = vadd.f32 %v1342_v42, %v1334_v17  ;;  %v1347_v30 = vadd.f32 %v1343_v43, %v1335_v22 }
 0x107   : > { %v1358_v33 = vadd.f32 %v1354_v63, %v1346_v25  ;;  %v1359_v46 = vadd.f32 %v1355_v16, %v1347_v30 }
 0x109   : > { %v1370_v8 = vadd.f32 %v1366_v31, %v1358_v33  ;;  %v1371_v18 = vadd.f32 %v1367_v32, %v1359_v46 }
 0x10b   : > { %v1382_v19 = vadd.f32 %v1378_v47, %v1370_v8  ;;  %v1383_v44 = vadd.f32 %v1379_v7, %v1371_v18 }
 0x10d   : > { %v1386_v45 = vcombine.low %v1382_v19, %v1383_v44 }
 0x10f   : > { %v1393_v52 = vrot.slane %v1386_v45, %v2037_v13 }
 0x111   : > { %v1400_v56 = vrot.slane %v1393_v52, %v2037_v13 }
 0x113   : > { %1636 = vst.msk [vmem:[%s2361_s5 + $0x2] ss:$4 sm:$0x3] %vm2313_vm0, %v1400_v56 }
 0x114 PF: > { %s18_s17 = sadd.s32 1, %s1844_s17   ;;  %s2622_s12 = smov %s1828_s13 }
 0x115   : > { %p15_p4 = scmp.ge.s32.totalorder %s18_s17, 4   ;;  %s2623_s13 = smov %s1832_s14 }
 0x116   : > { %s2624_s14 = smov %s1973_s7  ;;  %s2625_s15 = smov %s1840_s16 }
 0x117   : > { %s2626_s16 = smov %s2628_s28  ;;  %17 = sbr.rel (!%p15_p4) target bundleno = 6 (0x6), region = 84 }
 0x11e   :  { %1434 = vsyncpa [#allocation3], 1 }
 0x11f   :  { %1436 = vsyncpa [#allocation3 + $0x1], 1 }
 0x120   :  { %1437 = vsyncpa [#allocation4], 1 }
 0x121   :  { %1439 = vsyncpa [#allocation4 + $0x1], 1 }
 0x122   :  { %1440 = vsyncpa [#allocation5], 1 }
 0x123   :  { %1442 = vsyncpa [#allocation5 + $0x1], 1 }

</bundles_post_ra>
